<compile_context>
chip_gen: v6e
topology: v6e:2x2x1
jax: 0.10.0
libtpu: 0.0.40
codegen_flags: <defaults>
</compile_context>

<pallas_src>
import functools

import jax
import jax.numpy as jnp
from jax.experimental import pallas as pl
from jax.experimental.pallas import tpu as pltpu

NUM_MODELS = 3
PER_MODEL_OUT = 2                       # each sub-model emits 2 features
FC_IN = NUM_MODELS * PER_MODEL_OUT      # 6
FC_OUT = 2

FOLD = 64                               # rows folded per output row -> 64*2 = 128 lanes
SMALL_B = 4096                          # below this, one XLA fusion beats a kernel launch
DEFAULT_BLOCK_ROWS = 65536              # original rows per grid step (folded rows = /FOLD)


def _fused_block_kernel(x_ref, w_ref, b_ref, o_ref):
    # x tile arrives from HBM as f32 (no wrapper-side cast => no extra HBM copy
    # of x); cast to bf16 in VMEM right before the MXU so even v5e's 64x-wasted
    # block-diagonal matmul stays hidden under the per-tile DMA.  f32 accumulate,
    # f32 bias broadcast-add rides in free VPU slots, f32 store (lane-dense).
    x_bf = x_ref[...].astype(jnp.bfloat16)
    acc = jnp.dot(x_bf, w_ref[...], preferred_element_type=jnp.float32)
    o_ref[...] = (acc + b_ref[...]).astype(o_ref.dtype)


@functools.partial(jax.jit, static_argnames=("block_rows", "fold"))
def fusion1_forward(x, w_models, b_models, w_fc, b_fc, *,
                    block_rows=DEFAULT_BLOCK_ROWS, fold=FOLD):
    """x: (B, D_in) f32.  w_models: (D_in, 6), b_models: (1, 6),
    w_fc: (6, 2), b_fc: (1, 2).  Returns (B, 2) f32."""
    B, D = x.shape

    # --- trace-time algebraic fold (heads -> cat -> fc is affine end to end) --
    w_fused = w_models @ w_fc                      # (D, 2)  f32
    b_fused = b_models @ w_fc + b_fc               # (1, 2)  f32

    # --- small-B fast path: a single pallas step would be pure launch overhead
    if B < SMALL_B:
        return x @ w_fused + b_fused

    # --- lane-dense fold ------------------------------------------------------
    # Pad B to a multiple of `fold` if needed (rare; costs one copy of x, noted).
    Bp = ((B + fold - 1) // fold) * fold
    xp = x if Bp == B else jnp.pad(x, ((0, Bp - B), (0, 0)))

    Bf = Bp // fold                                # folded rows
    Df = fold * D                                  # folded x lanes (64*32 = 2048)
    Nf = fold * FC_OUT                             # folded out lanes (64*2 = 128)
    x_f = xp.reshape(Bf, Df)                       # row-major metadata reshape: free

    # Block-diagonal weights: out[r, f*2+n] = sum_d x[r*fold+f, d] * w_fused[d, n]
    w_block = jnp.kron(jnp.eye(fold, dtype=w_fused.dtype),
                       w_fused).astype(jnp.bfloat16)       # (Df, Nf), VMEM resident
    b_block = jnp.tile(b_fused, (1, fold))                  # (1, Nf) f32

    # --- tile selection -------------------------------------------------------
    # Target ~block_rows original rows per step (several µs of HBM traffic) and
    # force >= 2 grid steps so v7x's two TensorCores both get batch tiles.
    block_bf = max(8, block_rows // fold)
    grid_n = max(2, pl.cdiv(Bf, block_bf))
    tb = ((pl.cdiv(Bf, grid_n) + 7) // 8) * 8               # sublane multiple of 8
    grid_n = pl.cdiv(Bf, tb)

    out_f = pl.pallas_call(
        _fused_block_kernel,
        out_shape=jax.ShapeDtypeStruct((Bf, Nf), jnp.float32),
        grid=(grid_n,),
        in_specs=[
            pl.BlockSpec((tb, Df), lambda i: (i, 0)),       # f32 x tile (lane-dense)
            pl.BlockSpec((Df, Nf), lambda i: (0, 0)),       # resident bf16 block-diag W
            pl.BlockSpec((1, Nf), lambda i: (0, 0)),        # resident f32 bias
        ],
        out_specs=pl.BlockSpec((tb, Nf), lambda i: (i, 0)), # lane-dense (128) output
        compiler_params=pltpu.CompilerParams(
            dimension_semantics=("parallel",),              # v7x: split tiles across TCs
            vmem_limit_bytes=40 * 1024 * 1024,              # ~18 MiB actual use; fits all gens
        ),
    )(x_f, w_block, b_block)

    out = out_f.reshape(Bp, FC_OUT)                         # free reshape back
    return out if Bp == B else out[:B]


# ----------------------------- references ------------------------------------
def reference_forward_f32(x, w_models, b_models, w_fc, b_fc):
    """Pure-JAX reference mirroring the PyTorch module: 3 heads -> cat -> fc."""
    outs = []
    for m in range(NUM_MODELS):
        wm = w_models[:, m * PER_MODEL_OUT:(m + 1) * PER_MODEL_OUT]
        bm = b_models[:, m * PER_MODEL_OUT:(m + 1) * PER_MODEL_OUT]
        outs.append(x @ wm + bm)
    cat = jnp.concatenate(outs, axis=1)                     # (B, 6)
    return cat @ w_fc + b_fc                                # (B, 2)


def reference_forward_bf16(x, w_models, b_models, w_fc, b_fc):
    """Same fold + bf16 MXU operands as the kernel (for a tight check)."""
    w_fused = (w_models @ w_fc).astype(jnp.bfloat16)
    b_fused = b_models @ w_fc + b_fc
    acc = jnp.dot(x.astype(jnp.bfloat16), w_fused,
                  preferred_element_type=jnp.float32)
    return acc + b_fused


if __name__ == "__main__":
    key = jax.random.PRNGKey(0)
    D_IN = 32

    keys = jax.random.split(key, 6)
    # Three synthesized Linear(D_IN, 2) heads stored concatenated along the
    # output axis -> (D_IN, 6); fc stored as (in, out) = (6, 2).
    w_models = jax.random.normal(keys[1], (D_IN, FC_IN), jnp.float32) * 0.1
    b_models = jax.random.normal(keys[2], (1, FC_IN), jnp.float32) * 0.1
    w_fc = jax.random.normal(keys[3], (FC_IN, FC_OUT), jnp.float32) * 0.1
    b_fc = jax.random.normal(keys[4], (1, FC_OUT), jnp.float32) * 0.1

    # --- kernel path: B big enough for the pallas path, non-divisible by FOLD
    #     and by the tile (exercises padding + partial-tile clipping). --------
    B_big = 8229
    x_big = jax.random.normal(keys[0], (B_big, D_IN), dtype=jnp.float32)
    out_big = jax.block_until_ready(fusion1_forward(x_big, w_models, b_models, w_fc, b_fc))
    assert out_big.shape == (B_big, FC_OUT)

    ref_bf16 = reference_forward_bf16(x_big, w_models, b_models, w_fc, b_fc)
    ref_f32 = reference_forward_f32(x_big, w_models, b_models, w_fc, b_fc)
    assert jnp.allclose(out_big, ref_bf16, atol=1e-4, rtol=1e-4), "mismatch vs bf16 ref"
    assert jnp.allclose(out_big, ref_f32, atol=2e-2, rtol=2e-2), "mismatch vs f32 ref"

    # --- small-B fast path (plain-JAX, exact f32) -----------------------------
    B_small = 8
    x_small = jax.random.normal(keys[5], (B_small, D_IN), dtype=jnp.float32)
    out_small = jax.block_until_ready(fusion1_forward(x_small, w_models, b_models, w_fc, b_fc))
    ref_small = reference_forward_f32(x_small, w_models, b_models, w_fc, b_fc)
    assert out_small.shape == (B_small, FC_OUT)
    assert jnp.allclose(out_small, ref_small, atol=1e-5, rtol=1e-5), "mismatch (fast path)"

    print("KERNEL_OK")
</pallas_src>

<mosaic_0001>
module attributes {stable_mosaic.version = 11 : i64} {
  func.func @_fused_block_kernel(%arg0: i32, %arg1: memref<72x2048xf32, #tpu.memory_space<vmem>>, %arg2: memref<2048x128xbf16, #tpu.memory_space<vmem>>, %arg3: memref<1x128xf32, #tpu.memory_space<vmem>>, %arg4: memref<72x128xf32, #tpu.memory_space<vmem>>) attributes {dimension_semantics = [#tpu.dimension_semantics<parallel>], iteration_bounds = array<i64: 2>, scalar_prefetch = 0 : i64, scratch_operands = 0 : i64, tpu.core_type = #tpu.core_type<tc>, window_params = [{transform_indices = @transform_0, window_bounds = array<i64: 72, 2048>}, {pipeline_mode = #tpu.pipeline_mode<synchronous>, transform_indices = @transform_1, window_bounds = array<i64: 2048, 128>}, {pipeline_mode = #tpu.pipeline_mode<synchronous>, transform_indices = @transform_2, window_bounds = array<i64: 1, 128>}, {transform_indices = @transform_3, window_bounds = array<i64: 72, 128>}]} {
    %c0 = arith.constant 0 : index
    %c0_0 = arith.constant 0 : index
    %0 = vector.load %arg1[%c0, %c0_0] : memref<72x2048xf32, #tpu.memory_space<vmem>>, vector<72x2048xf32>
    %1 = arith.truncf %0 : vector<72x2048xf32> to vector<72x2048xbf16>
    %c0_1 = arith.constant 0 : index
    %c0_2 = arith.constant 0 : index
    %2 = vector.load %arg2[%c0_1, %c0_2] : memref<2048x128xbf16, #tpu.memory_space<vmem>>, vector<2048x128xbf16>
    %cst = arith.constant dense<0.000000e+00> : vector<72x128xf32>
    %3 = tpu.matmul %1, %2, %cst {dimension_numbers = #tpu.dot_dimension_numbers<[1], [0], [0], [1], [0, 0, 1, 1], [], []>} : vector<72x2048xbf16>, vector<2048x128xbf16>, vector<72x128xf32> -> vector<72x128xf32>
    %c0_3 = arith.constant 0 : index
    %c0_4 = arith.constant 0 : index
    %4 = vector.load %arg3[%c0_3, %c0_4] : memref<1x128xf32, #tpu.memory_space<vmem>>, vector<1x128xf32>
    %5 = vector.broadcast %4 : vector<1x128xf32> to vector<72x128xf32>
    %6 = arith.addf %3, %5 : vector<72x128xf32>
    %c0_5 = arith.constant 0 : index
    %c0_6 = arith.constant 0 : index
    %7 = vector.load %arg4[%c0_5, %c0_6] : memref<72x128xf32, #tpu.memory_space<vmem>>, vector<72x128xf32>
    tpu.vector_store %arg4[%c0_5, %c0_6], %6 {strides = array<i32>} : memref<72x128xf32, #tpu.memory_space<vmem>>, vector<72x128xf32>,
    return
  }
  func.func @transform_0(%arg0: i32) -> (i32, i32) {
    %c0_i32 = arith.constant 0 : i32
    %c0_i32_0 = arith.constant 0 : i32
    return %arg0, %c0_i32 : i32, i32
  }
  func.func @transform_1(%arg0: i32) -> (i32, i32) {
    %c0_i32 = arith.constant 0 : i32
    %c0_i32_0 = arith.constant 0 : i32
    %c0_i32_1 = arith.constant 0 : i32
    return %c0_i32, %c0_i32_0 : i32, i32
  }
  func.func @transform_2(%arg0: i32) -> (i32, i32) {
    %c0_i32 = arith.constant 0 : i32
    %c0_i32_0 = arith.constant 0 : i32
    %c0_i32_1 = arith.constant 0 : i32
    return %c0_i32, %c0_i32_0 : i32, i32
  }
  func.func @transform_3(%arg0: i32) -> (i32, i32) {
    %c0_i32 = arith.constant 0 : i32
    %c0_i32_0 = arith.constant 0 : i32
    return %arg0, %c0_i32 : i32, i32
  }
}

</mosaic_0001>

<bundles_post_ra>
// kernel: fusion1_forward.1
= control target key start
LH: loop header
LB: loop body
LE: loop exit
PB: predicated region body
PF: predicated region fallthrough
CT: control target
= control target key end

     0   :  { %s3138_s12 = smov 0   ;;  %s3140_s13 = smov 0   ;;  %s3904_s0 = inlined_call_operand.vmem [shape: f32[129,2048], index: 0, kind: input, shape index: {}]   ;;  %s3905_s1 = inlined_call_operand.vmem [shape: bf16[2048,128], index: 1, kind: input, shape index: {}]   ;;  %s3906_s2 = inlined_call_operand.vmem [shape: f32[1,128], index: 2, kind: input, shape index: {}]   ;;  %s3907_s3 = inlined_call_operand.vmem [shape: f32[129,128], index: 3, kind: output, shape index: {}]  }
   0x1   :  { %s3142_s14 = smov 0  }
   0x2 LB: > { %s3151_s15 = sadd.s32 4294967295, %s3084_s14   ;;  %s3153_s16 = sadd.s32 1, %s3084_s14   ;;  %s3084_s14 = sphi %s3142_s14, %s3914_s14   ;;  %s3080_s13 = sphi %s3140_s13, %s3913_s13   ;;  %s3076_s12 = sphi %s3138_s12, %s3912_s12  }
   0x3   : > { %s85_s17 = ssub.s32 %s3084_s14, %s3153_s16  ;;  %s88_s18 = sadd.s32 1, %s3080_s13 }
   0x4   : > { %p86_p0 = scmp.eq.s32.totalorder %s85_s17, 0  ;;  %p98_p1 = scmp.ne.s32.totalorder %s3080_s13, %s3076_s12 }
   0x5   : > { %p99_p2 = scmp.eq.s32.totalorder %s3151_s15, 1  ;;  %p2294_p3 = scmp.ge.s32.totalorder %s3084_s14, 1 }
   0x6   : > { %s3161_s19 = scalar_select %p86_p0, %s3080_s13, %s88_s18  }
   0x7   : > { %p3163_p4 = por %p99_p2, %p98_p1  ;;  %p149_p5 = scmp.lt.s32.totalorder %s3084_s14, 3 }
   0x9   : > { %p150_p6 = pnand %p2294_p3, %p149_p5 }
   0xa   : > { %s3213_s30 = smul.u32 (!%p150_p6), 9, %s3151_s15 }
   0xb   : > { %153 = sbr.rel (%p150_p6) target bundleno = 457 (0x1c9), region = 32 }
   0xc   : > { %p184_p7 = scmp.lt.s32.totalorder (!%p150_p6), %s3213_s30, 16 }
  0x10   : > { %v2898_v0 = vld [vmem:[%s3905_s1 + $0x78] sm:$0xff]   ;;  %v2902_v4 = vld [vmem:[%s3905_s1 + $0x70] sm:$0xff]   ;;  %v2906_v8 = vld [vmem:[%s3905_s1 + $0x68] sm:$0xff]   ;;  %s185_s26 = scalar_select %p184_p7, %s3213_s30, 16 }
  0x11   : > { %v2899_v1 = vld [vmem:[%s3905_s1 + $0xf8] sm:$0xff]   ;;  %2440 = vmatprep.subr.bf16.mxu0 %v2898_v0  ;;  %v2903_v5 = vld [vmem:[%s3905_s1 + $0xf0] sm:$0xff]   ;;  %v2907_v9 = vld [vmem:[%s3905_s1 + $0xe8] sm:$0xff]   ;;  %s2049_s8 = ssub.s32 (%p3163_p4), 17, %s3213_s30 }
  0x12   : > { %v2900_v2 = vld [vmem:[%s3905_s1 + $0x38] sm:$0xff]   ;;  %2486 = vmatprep.subr.bf16.mxu1 %v2899_v1  ;;  %v2904_v6 = vld [vmem:[%s3905_s1 + $0x30] sm:$0xff]   ;;  %v2908_v10 = vld [vmem:[%s3905_s1 + $0x28] sm:$0xff]   ;;  %s2438_s9 = sshll.u32 %s185_s26, 7  ;;  %p2050_p8 = scmp.lt.s32.totalorder (%p3163_p4), %s2049_s8, 9 }
  0x13   : > { %v2901_v3 = vld [vmem:[%s3905_s1 + $0xb8] sm:$0xff]   ;;  %2441 = vmatpush3.bf16.msra.mxu0 %v2900_v2  ;;  %v2905_v7 = vld [vmem:[%s3905_s1 + $0xb0] sm:$0xff]   ;;  %v2909_v11 = vld [vmem:[%s3905_s1 + $0xa8] sm:$0xff]   ;;  %s3265_s24 = scalar_lea.vmem %s3904_s0, %s2438_s9  ;;  %s2439_s9 = smul.u32 (%p3163_p4), 72, %s3151_s15 }
  0x14   : > { %2487 = vmatpush3.bf16.msra.mxu1 %v2901_v3  ;;  %2442 = vmatprep.subr.bf16.mxu0 %v2902_v4  ;;  %v2910_v12 = vld [vmem:[%s3905_s1 + $0x60] sm:$0xff]   ;;  %v2914_v16 = vld [vmem:[%s3905_s1 + $0x58] sm:$0xff]   ;;  %v2918_v20 = vld [vmem:[%s3905_s1 + $0x50] sm:$0xff]  }
  0x15   : > { %2488 = vmatprep.subr.bf16.mxu1 %v2903_v5  ;;  %v2911_v13 = vld [vmem:[%s3905_s1 + $0xe0] sm:$0xff]   ;;  %v2915_v17 = vld [vmem:[%s3905_s1 + $0xd8] sm:$0xff]   ;;  %v2919_v21 = vld [vmem:[%s3905_s1 + $0xd0] sm:$0xff]   ;;  %s3852_s14 = scalar_lea.vmem (%p3163_p4), %s3907_s3, %s2439_s9  }
  0x16   : > { %v2912_v14 = vld [vmem:[%s3905_s1 + $0x20] sm:$0xff]   ;;  %v2916_v18 = vld [vmem:[%s3905_s1 + $0x18] sm:$0xff]   ;;  %v2920_v22 = vld [vmem:[%s3905_s1 + $0x10] sm:$0xff]  }
  0x17   : > { %2443 = vmatpush3.bf16.msra.mxu0 %v2904_v6  ;;  %v2913_v15 = vld [vmem:[%s3905_s1 + $0xa0] sm:$0xff]   ;;  %v2917_v19 = vld [vmem:[%s3905_s1 + $0x98] sm:$0xff]   ;;  %v2921_v23 = vld [vmem:[%s3905_s1 + $0x90] sm:$0xff]  }
  0x18   : > { %2489 = vmatpush3.bf16.msra.mxu1 %v2905_v7  ;;  %2444 = vmatprep.subr.bf16.mxu0 %v2906_v8  ;;  %v2922_v24 = vld [vmem:[%s3905_s1 + $0x48] sm:$0xff]   ;;  %v2926_v28 = vld [vmem:[%s3905_s1 + $0x40] sm:$0xff]   ;;  %v204_v34 = vld [vmem:[%s3265_s24 + $0x18] sm:$0xff] }
  0x19   : > { %2490 = vmatprep.subr.bf16.mxu1 %v2907_v9  ;;  %v2923_v25 = vld [vmem:[%s3905_s1 + $0xc8] sm:$0xff]   ;;  %v2927_v29 = vld [vmem:[%s3905_s1 + $0xc0] sm:$0xff]   ;;  %v220_v36 = vld [vmem:[%s3265_s24 + $0x98] sm:$0xff] }
  0x1a   : > { %v2924_v26 = vld [vmem:[%s3905_s1 + $0x8] sm:$0xff]   ;;  %v2928_v30 = vld [vmem:[%s3905_s1] sm:$0xff]   ;;  %v348_v39 = vpack.c.bf16 %v220_v36, %v204_v34  ;;  %v203_v41 = vld [vmem:[%s3265_s24 + $0x10] sm:$0xff] }
  0x1b   : > { %2445 = vmatpush3.bf16.msra.mxu0 %v2908_v10  ;;  %v2925_v27 = vld [vmem:[%s3905_s1 + $0x88] sm:$0xff]   ;;  %v2929_v31 = vld [vmem:[%s3905_s1 + $0x80] sm:$0xff]   ;;  %v219_v42 = vld [vmem:[%s3265_s24 + $0x90] sm:$0xff] }
  0x1c   : > { %2491 = vmatpush3.bf16.msra.mxu1 %v2909_v11  ;;  %2446 = vmatprep.subr.bf16.mxu0 %v2910_v12  ;;  %v202_v32 = vld [vmem:[%s3265_s24 + $0x8] sm:$0xff]  ;;  %v201_v37 = vld [vmem:[%s3265_s24] sm:$0xff]  ;;  %v347_v43 = vpack.c.bf16 %v219_v42, %v203_v41  ;;  %v2930_v44 = vld [vmem:[%s3905_s1 + $0x178] sm:$0xff]  }
  0x1d   : > { %2492 = vmatprep.subr.bf16.mxu1 %v2911_v13  ;;  %v218_v33 = vld [vmem:[%s3265_s24 + $0x88] sm:$0xff]  ;;  %v217_v38 = vld [vmem:[%s3265_s24 + $0x80] sm:$0xff]  ;;  %1560 = vmatprep.mubr.bf16.mxu1 %v348_v39  ;;  %v2931_v45 = vld [vmem:[%s3905_s1 + $0x138] sm:$0xff]  }
  0x1e   : > { %v346_v35 = vpack.c.bf16 %v218_v33, %v202_v32  ;;  %v345_v40 = vpack.c.bf16 %v217_v38, %v201_v37  ;;  %v2932_v46 = vld [vmem:[%s3905_s1 + $0x1f8] sm:$0xff]   ;;  %v2934_v48 = vld [vmem:[%s3905_s1 + $0x170] sm:$0xff]   ;;  %v234_v50 = vld [vmem:[%s3265_s24 + $0x108] sm:$0xff] }
  0x1f   : > { %2447 = vmatpush3.bf16.msra.mxu0 %v2912_v14  ;;  %v2933_v47 = vld [vmem:[%s3905_s1 + $0x1b8] sm:$0xff]   ;;  %v2935_v49 = vld [vmem:[%s3905_s1 + $0x130] sm:$0xff]   ;;  %v250_v51 = vld [vmem:[%s3265_s24 + $0x188] sm:$0xff] }
  0x20   : > { %2493 = vmatpush3.bf16.msra.mxu1 %v2913_v15  ;;  %2448 = vmatprep.subr.bf16.mxu0 %v2914_v16  ;;  %v236_v52 = vld [vmem:[%s3265_s24 + $0x118] sm:$0xff]  ;;  %v362_v54 = vpack.c.bf16 %v250_v51, %v234_v50  ;;  %v2936_v56 = vld [vmem:[%s3905_s1 + $0x1f0] sm:$0xff]   ;;  %v233_v57 = vld [vmem:[%s3265_s24 + $0x100] sm:$0xff] }
  0x21   : > { %2494 = vmatprep.subr.bf16.mxu1 %v2915_v17  ;;  %1488 = vmatprep.mubr.bf16.mxu0 %v346_v35  ;;  %v252_v53 = vld [vmem:[%s3265_s24 + $0x198] sm:$0xff]  ;;  %v249_v58 = vld [vmem:[%s3265_s24 + $0x180] sm:$0xff]  ;;  %v235_v59 = vld [vmem:[%s3265_s24 + $0x110] sm:$0xff] }
  0x22   : > { %v364_v55 = vpack.c.bf16 %v252_v53, %v236_v52  ;;  %v361_v60 = vpack.c.bf16 %v249_v58, %v233_v57  ;;  %v251_v61 = vld [vmem:[%s3265_s24 + $0x190] sm:$0xff]  ;;  %v2938_v0 = vld [vmem:[%s3905_s1 + $0x168] sm:$0xff]   ;;  %v268_v7 = vld [vmem:[%s3265_s24 + $0x218] sm:$0xff] }
  0x23   : > { %2449 = vmatpush3.bf16.msra.mxu0 %v2916_v18  ;;  %v363_v62 = vpack.c.bf16 %v251_v61, %v235_v59  ;;  %v2937_v63 = vld [vmem:[%s3905_s1 + $0x1b0] sm:$0xff]   ;;  %v2939_v1 = vld [vmem:[%s3905_s1 + $0x128] sm:$0xff]   ;;  %v284_v8 = vld [vmem:[%s3265_s24 + $0x298] sm:$0xff] }
  0x24   : > { %2495 = vmatpush3.bf16.msra.mxu1 %v2917_v19  ;;  %2450 = vmatprep.subr.bf16.mxu0 %v2918_v20  ;;  %v2940_v2 = vld [vmem:[%s3905_s1 + $0x1e8] sm:$0xff]   ;;  %v380_v9 = vpack.c.bf16 %v284_v8, %v268_v7  ;;  %v2942_v10 = vld [vmem:[%s3905_s1 + $0x160] sm:$0xff]   ;;  %v267_v13 = vld [vmem:[%s3265_s24 + $0x210] sm:$0xff] }
  0x25   : > { %2496 = vmatprep.subr.bf16.mxu1 %v2919_v21  ;;  %v2941_v3 = vld [vmem:[%s3905_s1 + $0x1a8] sm:$0xff]   ;;  %v265_v11 = vld [vmem:[%s3265_s24 + $0x200] sm:$0xff]  ;;  %v283_v14 = vld [vmem:[%s3265_s24 + $0x290] sm:$0xff] }
  0x26   : > { %v266_v4 = vld [vmem:[%s3265_s24 + $0x208] sm:$0xff]  ;;  %v281_v12 = vld [vmem:[%s3265_s24 + $0x280] sm:$0xff]  ;;  %v379_v16 = vpack.c.bf16 %v283_v14, %v267_v13  ;;  %v2946_v20 = vld [vmem:[%s3905_s1 + $0x158] sm:$0xff]  }
  0x27   : > { %2451 = vmatpush3.bf16.msra.mxu0 %v2920_v22  ;;  %v282_v5 = vld [vmem:[%s3265_s24 + $0x288] sm:$0xff]  ;;  %v377_v15 = vpack.c.bf16 %v281_v12, %v265_v11  ;;  %v2943_v17 = vld [vmem:[%s3905_s1 + $0x120] sm:$0xff]   ;;  %v2947_v21 = vld [vmem:[%s3905_s1 + $0x118] sm:$0xff]  }
  0x28   : > { %2497 = vmatpush3.bf16.msra.mxu1 %v2921_v23  ;;  %2452 = vmatprep.subr.bf16.mxu0 %v2922_v24  ;;  %v378_v6 = vpack.c.bf16 %v282_v5, %v266_v4  ;;  %v2944_v18 = vld [vmem:[%s3905_s1 + $0x1e0] sm:$0xff]   ;;  %v2948_v22 = vld [vmem:[%s3905_s1 + $0x1d8] sm:$0xff]   ;;  %v298_v23 = vld [vmem:[%s3265_s24 + $0x308] sm:$0xff] }
  0x29   : > { %2498 = vmatprep.subr.bf16.mxu1 %v2923_v25  ;;  %v2945_v19 = vld [vmem:[%s3905_s1 + $0x1a0] sm:$0xff]   ;;  %v314_v24 = vld [vmem:[%s3265_s24 + $0x388] sm:$0xff]  ;;  %v300_v25 = vld [vmem:[%s3265_s24 + $0x318] sm:$0xff] }
  0x2a   : > { %v299_v33 = vld [vmem:[%s3265_s24 + $0x310] sm:$0xff]  ;;  %v330_v41 = vld [vmem:[%s3265_s24 + $0x408] sm:$0xff]  ;;  %v2958_v52 = vld [vmem:[%s3905_s1 + $0x140] sm:$0xff]  }
  0x2b   : > { %2453 = vmatpush3.bf16.msra.mxu0 %v2924_v26  ;;  %v394_v26 = vpack.c.bf16 %v314_v24, %v298_v23  ;;  %v315_v34 = vld [vmem:[%s3265_s24 + $0x390] sm:$0xff]  ;;  %v410_v42 = vpack.c.bf16 %v330_v41, %v330_v41  ;;  %v2956_v50 = vld [vmem:[%s3905_s1 + $0x1c8] sm:$0xff]   ;;  %v2959_v53 = vld [vmem:[%s3905_s1 + $0x100] sm:$0xff]  }
  0x2c   : > { %2499 = vmatpush3.bf16.msra.mxu1 %v2925_v27  ;;  %2454 = vmatprep.subr.bf16.mxu0 %v2926_v28  ;;  %v316_v27 = vld [vmem:[%s3265_s24 + $0x398] sm:$0xff]  ;;  %v395_v35 = vpack.c.bf16 %v315_v34, %v299_v33  ;;  %v2950_v36 = vld [vmem:[%s3905_s1 + $0x150] sm:$0xff]   ;;  %v2957_v51 = vld [vmem:[%s3905_s1 + $0x188] sm:$0xff]  }
  0x2d   : > { %2500 = vmatprep.subr.bf16.mxu1 %v2927_v29  ;;  %v396_v28 = vpack.c.bf16 %v316_v27, %v300_v25  ;;  %v2949_v29 = vld [vmem:[%s3905_s1 + $0x198] sm:$0xff]   ;;  %v2951_v37 = vld [vmem:[%s3905_s1 + $0x110] sm:$0xff]   ;;  %v222_v57 = vld [vmem:[%s3265_s24 + $0xa8] sm:$0xff] }
  0x2e   : > { %v2952_v38 = vld [vmem:[%s3905_s1 + $0x1d0] sm:$0xff]   ;;  %v208_v58 = vld [vmem:[%s3265_s24 + $0x38] sm:$0xff]  ;;  %v205_v61 = vld [vmem:[%s3265_s24 + $0x20] sm:$0xff] }
  0x2f   : > { %2455 = vmatpush3.bf16.msra.mxu0 %v2928_v30  ;;  %v297_v30 = vld [vmem:[%s3265_s24 + $0x300] sm:$0xff]  ;;  %v2953_v39 = vld [vmem:[%s3905_s1 + $0x190] sm:$0xff]   ;;  %v2962_v4 = vld [vmem:[%s3905_s1 + $0x278] sm:$0xff]  }
  0x30   : > { %2501 = vmatpush3.bf16.msra.mxu1 %v2929_v31  ;;  %2532 = vmatprep.subr.bf16.mxu0 %v2930_v44  ;;  %v313_v31 = vld [vmem:[%s3265_s24 + $0x380] sm:$0xff]  ;;  %v2963_v5 = vld [vmem:[%s3905_s1 + $0x238] sm:$0xff]   ;;  %v2966_v8 = vld [vmem:[%s3905_s1 + $0x270] sm:$0xff]  }
  0x31   : > { %2578 = vmatprep.subr.bf16.mxu1 %v2932_v46  ;;  %v393_v32 = vpack.c.bf16 %v313_v31, %v297_v30  ;;  %v329_v46 = vld [vmem:[%s3265_s24 + $0x400] sm:$0xff]  ;;  %v2965_v7 = vld [vmem:[%s3905_s1 + $0x2b8] sm:$0xff]   ;;  %v254_v11 = vld [vmem:[%s3265_s24 + $0x1a8] sm:$0xff] }
  0x32   : > { %1489 = vmatmul.mubr.bf16.vlgmr.msra.gmra.mxu0 %v345_v40  ;;  %v2954_v40 = vld [vmem:[%s3905_s1 + $0x148] sm:$0xff]   ;;  %v240_v12 = vld [vmem:[%s3265_s24 + $0x138] sm:$0xff]  ;;  %v2969_v23 = vld [vmem:[%s3905_s1 + $0x2b0] sm:$0xff]  }
  0x33   : > { %1561 = vmatmul.mubr.bf16.vlgmr.msra.gmra.mxu1 %v347_v43  ;;  %2533 = vmatpush3.bf16.msra.mxu0 %v2931_v45  ;;  %v332_v43 = vld [vmem:[%s3265_s24 + $0x418] sm:$0xff]  ;;  %v2955_v45 = vld [vmem:[%s3905_s1 + $0x108] sm:$0xff]   ;;  %v2974_v34 = vld [vmem:[%s3905_s1 + $0x260] sm:$0xff]  }
  0x34   : > { %2579 = vmatpush3.bf16.msra.mxu1 %v2933_v47  ;;  %2534 = vmatprep.subr.bf16.mxu0 %v2934_v48  ;;  %v412_v44 = vpack.c.bf16 %v332_v43, %v332_v43  ;;  %v331_v47 = vld [vmem:[%s3265_s24 + $0x410] sm:$0xff]  ;;  %v409_v48 = vpack.c.bf16 %v329_v46, %v329_v46  ;;  %v256_v13 = vld [vmem:[%s3265_s24 + $0x1b8] sm:$0xff]  ;;  %v2970_v24 = vld [vmem:[%s3905_s1 + $0x268] sm:$0xff]  }
  0x35   : > { %1496 = vmatprep.mubr.bf16.mxu0 %v362_v54  ;;  %1568 = vmatprep.mubr.bf16.mxu1 %v364_v55  ;;  %v2960_v54 = vld [vmem:[%s3905_s1 + $0x1c0] sm:$0xff]   ;;  %v2971_v25 = vld [vmem:[%s3905_s1 + $0x228] sm:$0xff]   ;;  %v272_v31 = vld [vmem:[%s3265_s24 + $0x238] sm:$0xff] }
  0x36   : > { %2580 = vmatprep.subr.bf16.mxu1 %v2936_v56  ;;  %v2961_v55 = vld [vmem:[%s3905_s1 + $0x180] sm:$0xff]   ;;  %v206_v56 = vld [vmem:[%s3265_s24 + $0x28] sm:$0xff]  ;;  %v2980_v46 = vld [vmem:[%s3905_s1 + $0x2d8] sm:$0xff]  }
  0x37   : > { %2535 = vmatpush3.bf16.msra.mxu0 %v2935_v49  ;;  %v411_v49 = vpack.c.bf16 %v331_v47, %v331_v47  ;;  %v350_v59 = vpack.c.bf16 %v222_v57, %v206_v56  ;;  %v2973_v27 = vld [vmem:[%s3905_s1 + $0x2a8] sm:$0xff]   ;;  %v2975_v41 = vld [vmem:[%s3905_s1 + $0x220] sm:$0xff]   ;;  %v303_v57 = vld [vmem:[%s3265_s24 + $0x330] sm:$0xff] }
  0x38   : > { %2581 = vmatpush3.bf16.msra.mxu1 %v2937_v63  ;;  %2536 = vmatprep.subr.bf16.mxu0 %v2938_v0  ;;  %v2977_v43 = vld [vmem:[%s3905_s1 + $0x2a0] sm:$0xff]   ;;  %v302_v47 = vld [vmem:[%s3265_s24 + $0x328] sm:$0xff] }
  0x39   : > { %2582 = vmatprep.subr.bf16.mxu1 %v2940_v2  ;;  %v223_v2 = vld [vmem:[%s3265_s24 + $0xb0] sm:$0xff] }
  0x3a   : > { %1497 = vmatmul.mubr.bf16.gmra.mxu0 %v361_v60  ;;  %v224_v60 = vld [vmem:[%s3265_s24 + $0xb8] sm:$0xff] }
  0x3b   : > { %1569 = vmatmul.mubr.bf16.gmra.mxu1 %v363_v62  ;;  %2537 = vmatpush3.bf16.msra.mxu0 %v2939_v1  ;;  %v221_v62 = vld [vmem:[%s3265_s24 + $0xa0] sm:$0xff]  ;;  %v352_v63 = vpack.c.bf16 %v224_v60, %v208_v58  ;;  %v207_v1 = vld [vmem:[%s3265_s24 + $0x30] sm:$0xff] }
  0x3c   : > { %2583 = vmatpush3.bf16.msra.mxu1 %v2941_v3  ;;  %1504 = vmatprep.mubr.bf16.mxu0 %v378_v6  ;;  %v349_v0 = vpack.c.bf16 %v221_v62, %v205_v61  ;;  %v351_v3 = vpack.c.bf16 %v223_v2, %v207_v1  ;;  %v2964_v6 = vld [vmem:[%s3905_s1 + $0x2f8] sm:$0xff]   ;;  %v319_v58 = vld [vmem:[%s3265_s24 + $0x3b0] sm:$0xff]  ;;  %v334_v1 = vld [vmem:[%s3265_s24 + $0x428] sm:$0xff] }
  0x3d   : > { %1576 = vmatprep.mubr.bf16.mxu1 %v380_v9  ;;  %2538 = vmatprep.subr.bf16.mxu0 %v2942_v10  ;;  %v2967_v9 = vld [vmem:[%s3905_s1 + $0x230] sm:$0xff]   ;;  %v238_v10 = vld [vmem:[%s3265_s24 + $0x128] sm:$0xff]  ;;  %v414_v2 = vpack.c.bf16 %v334_v1, %v334_v1  ;;  %v3007_v1 = vld [vmem:[%s3905_s1 + $0x320] sm:$0xff]  }
  0x3e   : > { %2584 = vmatprep.subr.bf16.mxu1 %v2944_v18  ;;  %v366_v14 = vpack.c.bf16 %v254_v11, %v238_v10  ;;  %v253_v18 = vld [vmem:[%s3265_s24 + $0x1a0] sm:$0xff]  ;;  %v2982_v60 = vld [vmem:[%s3905_s1 + $0x250] sm:$0xff]   ;;  %v2988_v10 = vld [vmem:[%s3905_s1 + $0x2c8] sm:$0xff]  }
  0x3f   : > { %2539 = vmatpush3.bf16.msra.mxu0 %v2943_v17  ;;  %v237_v17 = vld [vmem:[%s3265_s24 + $0x120] sm:$0xff]  ;;  %v2983_v61 = vld [vmem:[%s3905_s1 + $0x210] sm:$0xff]   ;;  %v2989_v11 = vld [vmem:[%s3905_s1 + $0x288] sm:$0xff]  }
  0x40   : > { %2585 = vmatpush3.bf16.msra.mxu1 %v2945_v19  ;;  %2540 = vmatprep.subr.bf16.mxu0 %v2946_v20  ;;  %v239_v19 = vld [vmem:[%s3265_s24 + $0x130] sm:$0xff]  ;;  %v365_v20 = vpack.c.bf16 %v253_v18, %v237_v17  ;;  %v226_v17 = vld [vmem:[%s3265_s24 + $0xc8] sm:$0xff]  ;;  %v212_v18 = vld [vmem:[%s3265_s24 + $0x58] sm:$0xff] }
  0x41   : > { %2586 = vmatprep.subr.bf16.mxu1 %v2948_v22  ;;  %v2984_v62 = vld [vmem:[%s3905_s1 + $0x2d0] sm:$0xff]  }
  0x42   : > { %1505 = vmatmul.mubr.bf16.gmra.mxu0 %v377_v15  ;;  %v368_v15 = vpack.c.bf16 %v256_v13, %v240_v12  ;;  %v2990_v12 = vld [vmem:[%s3905_s1 + $0x240] sm:$0xff]  }
  0x43   : > { %1577 = vmatmul.mubr.bf16.gmra.mxu1 %v379_v16  ;;  %2541 = vmatpush3.bf16.msra.mxu0 %v2947_v21  ;;  %v2968_v16 = vld [vmem:[%s3905_s1 + $0x2f0] sm:$0xff]   ;;  %v2991_v13 = vld [vmem:[%s3905_s1 + $0x200] sm:$0xff]  }
  0x44   : > { %1512 = vmatprep.mubr.bf16.mxu0 %v394_v26  ;;  %1584 = vmatprep.mubr.bf16.mxu1 %v396_v28  ;;  %v255_v21 = vld [vmem:[%s3265_s24 + $0x1b0] sm:$0xff]  ;;  %v2972_v26 = vld [vmem:[%s3905_s1 + $0x2e8] sm:$0xff]  }
  0x45   : > { %2587 = vmatpush3.bf16.msra.mxu1 %v2949_v29  ;;  %2542 = vmatprep.subr.bf16.mxu0 %v2950_v36  ;;  %v367_v22 = vpack.c.bf16 %v255_v21, %v239_v19  ;;  %v270_v28 = vld [vmem:[%s3265_s24 + $0x228] sm:$0xff]  ;;  %v285_v36 = vld [vmem:[%s3265_s24 + $0x2a0] sm:$0xff] }
  0x46   : > { %2588 = vmatprep.subr.bf16.mxu1 %v2952_v38  ;;  %v286_v29 = vld [vmem:[%s3265_s24 + $0x2a8] sm:$0xff]  ;;  %v287_v38 = vld [vmem:[%s3265_s24 + $0x2b0] sm:$0xff]  ;;  %v209_v21 = vld [vmem:[%s3265_s24 + $0x40] sm:$0xff] }
  0x47   : > { %2543 = vmatpush3.bf16.msra.mxu0 %v2951_v37  ;;  %v382_v30 = vpack.c.bf16 %v286_v29, %v270_v28  ;;  %v271_v37 = vld [vmem:[%s3265_s24 + $0x230] sm:$0xff]  ;;  %v2994_v28 = vld [vmem:[%s3905_s1 + $0x378] sm:$0xff]  }
  0x48   : > { %2544 = vmatprep.subr.bf16.mxu0 %v2954_v40  ;;  %v383_v40 = vpack.c.bf16 %v287_v38, %v271_v37  ;;  %v2995_v29 = vld [vmem:[%s3905_s1 + $0x338] sm:$0xff]  }
  0x49   : > { %2589 = vmatpush3.bf16.msra.mxu1 %v2953_v39  ;;  %v260_v37 = vld [vmem:[%s3265_s24 + $0x1d8] sm:$0xff] }
  0x4a   : > { %1513 = vmatmul.mubr.bf16.gmra.mxu0 %v393_v32  ;;  %2590 = vmatprep.subr.bf16.mxu1 %v2956_v50  ;;  %v288_v32 = vld [vmem:[%s3265_s24 + $0x2b8] sm:$0xff] }
  0x4b   : > { %1585 = vmatmul.mubr.bf16.gmra.mxu1 %v395_v35  ;;  %1520 = vmatprep.mubr.bf16.mxu0 %v410_v42  ;;  %v384_v33 = vpack.c.bf16 %v288_v32, %v272_v31  ;;  %v269_v35 = vld [vmem:[%s3265_s24 + $0x220] sm:$0xff]  ;;  %v2997_v31 = vld [vmem:[%s3905_s1 + $0x3b8] sm:$0xff]   ;;  %v2998_v32 = vld [vmem:[%s3905_s1 + $0x370] sm:$0xff]  }
  0x4c   : > { %1592 = vmatprep.mubr.bf16.mxu1 %v412_v44  ;;  %2545 = vmatpush3.bf16.msra.mxu0 %v2955_v45  ;;  %v381_v39 = vpack.c.bf16 %v285_v36, %v269_v35  ;;  %v2976_v42 = vld [vmem:[%s3905_s1 + $0x2e0] sm:$0xff]   ;;  %v2978_v44 = vld [vmem:[%s3905_s1 + $0x258] sm:$0xff]   ;;  %v258_v35 = vld [vmem:[%s3265_s24 + $0x1c8] sm:$0xff] }
  0x4d   : > { %2591 = vmatpush3.bf16.msra.mxu1 %v2957_v51  ;;  %2546 = vmatprep.subr.bf16.mxu0 %v2958_v52  ;;  %v2979_v45 = vld [vmem:[%s3905_s1 + $0x218] sm:$0xff]  }
  0x4e   : > { %2592 = vmatprep.subr.bf16.mxu1 %v2960_v54  ;;  %v320_v51 = vld [vmem:[%s3265_s24 + $0x3b8] sm:$0xff]  ;;  %v301_v54 = vld [vmem:[%s3265_s24 + $0x320] sm:$0xff] }
  0x4f   : > { %v244_v36 = vld [vmem:[%s3265_s24 + $0x158] sm:$0xff] }
  0x50   : > { %2547 = vmatpush3.bf16.msra.mxu0 %v2959_v53  ;;  %v2981_v53 = vld [vmem:[%s3905_s1 + $0x298] sm:$0xff]  }
  0x51   : > { %2593 = vmatpush3.bf16.msra.mxu1 %v2961_v55  ;;  %2624 = vmatprep.subr.bf16.mxu0 %v2962_v4  ;;  %v317_v55 = vld [vmem:[%s3265_s24 + $0x3a0] sm:$0xff] }
  0x52   : > { %1521 = vmatmul.mubr.bf16.gmra.mxu0 %v409_v48  ;;  %2670 = vmatprep.subr.bf16.mxu1 %v2964_v6  ;;  %v318_v48 = vld [vmem:[%s3265_s24 + $0x3a8] sm:$0xff]  ;;  %v397_v56 = vpack.c.bf16 %v317_v55, %v301_v54  ;;  %v333_v6 = vld [vmem:[%s3265_s24 + $0x420] sm:$0xff]  ;;  %v276_v55 = vld [vmem:[%s3265_s24 + $0x258] sm:$0xff] }
  0x53   : > { %1593 = vmatmul.mubr.bf16.gmra.mxu1 %v411_v49  ;;  %1632 = vmatprep.mubr.bf16.mxu0 %v350_v59  ;;  %v304_v49 = vld [vmem:[%s3265_s24 + $0x338] sm:$0xff]  ;;  %v398_v50 = vpack.c.bf16 %v318_v48, %v302_v47  ;;  %v399_v59 = vpack.c.bf16 %v319_v58, %v303_v57  ;;  %v3001_v47 = vld [vmem:[%s3905_s1 + $0x3b0] sm:$0xff]   ;;  %v3002_v48 = vld [vmem:[%s3905_s1 + $0x368] sm:$0xff]  }
  0x54   : > { %1704 = vmatprep.mubr.bf16.mxu1 %v352_v63  ;;  %v400_v52 = vpack.c.bf16 %v320_v51, %v304_v49  ;;  %v2985_v63 = vld [vmem:[%s3905_s1 + $0x290] sm:$0xff]   ;;  %v3003_v49 = vld [vmem:[%s3905_s1 + $0x328] sm:$0xff]   ;;  %v3006_v58 = vld [vmem:[%s3905_s1 + $0x360] sm:$0xff]  }
  0x55   : > { %v3005_v51 = vld [vmem:[%s3905_s1 + $0x3a8] sm:$0xff]  }
  0x5a   : > { %1633 = vmatmul.mubr.bf16.vlgmr.msra.gmra.mxu0 %v349_v0  ;;  %v2986_v0 = vld [vmem:[%s3905_s1 + $0x248] sm:$0xff]  }
  0x5b   : > { %1705 = vmatmul.mubr.bf16.vlgmr.msra.gmra.mxu1 %v351_v3  ;;  %2625 = vmatpush3.bf16.msra.mxu0 %v2963_v5  ;;  %v336_v3 = vld [vmem:[%s3265_s24 + $0x438] sm:$0xff]  ;;  %v2987_v5 = vld [vmem:[%s3905_s1 + $0x208] sm:$0xff]  }
  0x5c   : > { %2671 = vmatpush3.bf16.msra.mxu1 %v2965_v7  ;;  %2626 = vmatprep.subr.bf16.mxu0 %v2966_v8  ;;  %v416_v4 = vpack.c.bf16 %v336_v3, %v336_v3  ;;  %v335_v7 = vld [vmem:[%s3265_s24 + $0x430] sm:$0xff]  ;;  %v413_v8 = vpack.c.bf16 %v333_v6, %v333_v6  ;;  %v3009_v3 = vld [vmem:[%s3905_s1 + $0x3a0] sm:$0xff]   ;;  %v3012_v6 = vld [vmem:[%s3905_s1 + $0x3d8] sm:$0xff]  }
  0x5d   : > { %1640 = vmatprep.mubr.bf16.mxu0 %v366_v14  ;;  %1712 = vmatprep.mubr.bf16.mxu1 %v368_v15  ;;  %v2992_v14 = vld [vmem:[%s3905_s1 + $0x2c0] sm:$0xff]  }
  0x5e   : > { %2672 = vmatprep.subr.bf16.mxu1 %v2968_v16  ;;  %v2993_v15 = vld [vmem:[%s3905_s1 + $0x280] sm:$0xff]   ;;  %v210_v16 = vld [vmem:[%s3265_s24 + $0x48] sm:$0xff] }
  0x5f   : > { %2627 = vmatpush3.bf16.msra.mxu0 %v2967_v9  ;;  %v415_v9 = vpack.c.bf16 %v335_v7, %v335_v7  ;;  %v354_v19 = vpack.c.bf16 %v226_v17, %v210_v16  ;;  %v306_v7 = vld [vmem:[%s3265_s24 + $0x348] sm:$0xff]  ;;  %v307_v17 = vld [vmem:[%s3265_s24 + $0x350] sm:$0xff] }
  0x60   : > { %2673 = vmatpush3.bf16.msra.mxu1 %v2969_v23  ;;  %2628 = vmatprep.subr.bf16.mxu0 %v2970_v24 }
  0x61   : > { %2674 = vmatprep.subr.bf16.mxu1 %v2972_v26  ;;  %v227_v26 = vld [vmem:[%s3265_s24 + $0xd0] sm:$0xff] }
  0x62   : > { %1641 = vmatmul.mubr.bf16.gmra.mxu0 %v365_v20  ;;  %v228_v20 = vld [vmem:[%s3265_s24 + $0xd8] sm:$0xff] }
  0x63   : > { %1713 = vmatmul.mubr.bf16.gmra.mxu1 %v367_v22  ;;  %2629 = vmatpush3.bf16.msra.mxu0 %v2971_v25  ;;  %v225_v22 = vld [vmem:[%s3265_s24 + $0xc0] sm:$0xff]  ;;  %v356_v23 = vpack.c.bf16 %v228_v20, %v212_v18  ;;  %v211_v25 = vld [vmem:[%s3265_s24 + $0x50] sm:$0xff] }
  0x64   : > { %2675 = vmatpush3.bf16.msra.mxu1 %v2973_v27  ;;  %1648 = vmatprep.mubr.bf16.mxu0 %v382_v30  ;;  %v353_v24 = vpack.c.bf16 %v225_v22, %v209_v21  ;;  %v355_v27 = vpack.c.bf16 %v227_v26, %v211_v25  ;;  %v2996_v30 = vld [vmem:[%s3905_s1 + $0x3f8] sm:$0xff]   ;;  %v323_v18 = vld [vmem:[%s3265_s24 + $0x3d0] sm:$0xff]  ;;  %v338_v25 = vld [vmem:[%s3265_s24 + $0x448] sm:$0xff] }
  0x65   : > { %1720 = vmatprep.mubr.bf16.mxu1 %v384_v33  ;;  %2630 = vmatprep.subr.bf16.mxu0 %v2974_v34  ;;  %v2999_v33 = vld [vmem:[%s3905_s1 + $0x330] sm:$0xff]   ;;  %v242_v34 = vld [vmem:[%s3265_s24 + $0x148] sm:$0xff]  ;;  %v418_v26 = vpack.c.bf16 %v338_v25, %v338_v25 }
  0x66   : > { %2676 = vmatprep.subr.bf16.mxu1 %v2976_v42  ;;  %v370_v38 = vpack.c.bf16 %v258_v35, %v242_v34  ;;  %v257_v42 = vld [vmem:[%s3265_s24 + $0x1c0] sm:$0xff]  ;;  %v3014_v20 = vld [vmem:[%s3905_s1 + $0x350] sm:$0xff]   ;;  %v3020_v34 = vld [vmem:[%s3905_s1 + $0x3c8] sm:$0xff]  }
  0x67   : > { %2631 = vmatpush3.bf16.msra.mxu0 %v2975_v41  ;;  %v241_v41 = vld [vmem:[%s3265_s24 + $0x140] sm:$0xff]  ;;  %v3015_v21 = vld [vmem:[%s3905_s1 + $0x310] sm:$0xff]   ;;  %v3021_v35 = vld [vmem:[%s3905_s1 + $0x388] sm:$0xff]  }
  0x68   : > { %2677 = vmatpush3.bf16.msra.mxu1 %v2977_v43  ;;  %2632 = vmatprep.subr.bf16.mxu0 %v2978_v44  ;;  %v243_v43 = vld [vmem:[%s3265_s24 + $0x150] sm:$0xff]  ;;  %v369_v44 = vpack.c.bf16 %v257_v42, %v241_v41  ;;  %v230_v41 = vld [vmem:[%s3265_s24 + $0xe8] sm:$0xff]  ;;  %v216_v42 = vld [vmem:[%s3265_s24 + $0x78] sm:$0xff] }
  0x69   : > { %2678 = vmatprep.subr.bf16.mxu1 %v2980_v46  ;;  %v3016_v22 = vld [vmem:[%s3905_s1 + $0x3d0] sm:$0xff]  }
  0x6a   : > { %1649 = vmatmul.mubr.bf16.gmra.mxu0 %v381_v39  ;;  %v372_v39 = vpack.c.bf16 %v260_v37, %v244_v36  ;;  %v3022_v36 = vld [vmem:[%s3905_s1 + $0x340] sm:$0xff]  }
  0x6b   : > { %1721 = vmatmul.mubr.bf16.gmra.mxu1 %v383_v40  ;;  %2633 = vmatpush3.bf16.msra.mxu0 %v2979_v45  ;;  %v3000_v40 = vld [vmem:[%s3905_s1 + $0x3f0] sm:$0xff]   ;;  %v3023_v37 = vld [vmem:[%s3905_s1 + $0x300] sm:$0xff]  }
  0x6c   : > { %1656 = vmatprep.mubr.bf16.mxu0 %v398_v50  ;;  %1728 = vmatprep.mubr.bf16.mxu1 %v400_v52  ;;  %v259_v45 = vld [vmem:[%s3265_s24 + $0x1d0] sm:$0xff]  ;;  %v3004_v50 = vld [vmem:[%s3905_s1 + $0x3e8] sm:$0xff]  }
  0x6d   : > { %2679 = vmatpush3.bf16.msra.mxu1 %v2981_v53  ;;  %2634 = vmatprep.subr.bf16.mxu0 %v2982_v60  ;;  %v371_v46 = vpack.c.bf16 %v259_v45, %v243_v43  ;;  %v274_v52 = vld [vmem:[%s3265_s24 + $0x248] sm:$0xff]  ;;  %v289_v60 = vld [vmem:[%s3265_s24 + $0x2c0] sm:$0xff] }
  0x6e   : > { %2680 = vmatprep.subr.bf16.mxu1 %v2984_v62  ;;  %v290_v53 = vld [vmem:[%s3265_s24 + $0x2c8] sm:$0xff]  ;;  %v291_v62 = vld [vmem:[%s3265_s24 + $0x2d0] sm:$0xff]  ;;  %v213_v45 = vld [vmem:[%s3265_s24 + $0x60] sm:$0xff] }
  0x6f   : > { %2635 = vmatpush3.bf16.msra.mxu0 %v2983_v61  ;;  %v386_v54 = vpack.c.bf16 %v290_v53, %v274_v52  ;;  %v275_v61 = vld [vmem:[%s3265_s24 + $0x250] sm:$0xff]  ;;  %v262_v53 = vld [vmem:[%s3265_s24 + $0x1e8] sm:$0xff] }
  0x70   : > { %2636 = vmatprep.subr.bf16.mxu0 %v2986_v0  ;;  %v387_v0 = vpack.c.bf16 %v291_v62, %v275_v61  ;;  %v263_v61 = vld [vmem:[%s3265_s24 + $0x1f0] sm:$0xff]  ;;  %v278_v62 = vld [vmem:[%s3265_s24 + $0x268] sm:$0xff] }
  0x71   : > { %2681 = vmatpush3.bf16.msra.mxu1 %v2985_v63 }
  0x72   : > { %1657 = vmatmul.mubr.bf16.gmra.mxu0 %v397_v56  ;;  %2682 = vmatprep.subr.bf16.mxu1 %v2988_v10  ;;  %v292_v56 = vld [vmem:[%s3265_s24 + $0x2d8] sm:$0xff] }
  0x73   : > { %1729 = vmatmul.mubr.bf16.gmra.mxu1 %v399_v59  ;;  %1664 = vmatprep.mubr.bf16.mxu0 %v414_v2  ;;  %v388_v57 = vpack.c.bf16 %v292_v56, %v276_v55  ;;  %v273_v59 = vld [vmem:[%s3265_s24 + $0x240] sm:$0xff]  ;;  %v264_v55 = vld [vmem:[%s3265_s24 + $0x1f8] sm:$0xff] }
  0x74   : > { %1736 = vmatprep.mubr.bf16.mxu1 %v416_v4  ;;  %2637 = vmatpush3.bf16.msra.mxu0 %v2987_v5  ;;  %v385_v63 = vpack.c.bf16 %v289_v60, %v273_v59  ;;  %v3008_v2 = vld [vmem:[%s3905_s1 + $0x3e0] sm:$0xff]   ;;  %v3010_v4 = vld [vmem:[%s3905_s1 + $0x358] sm:$0xff]   ;;  %v247_v60 = vld [vmem:[%s3265_s24 + $0x170] sm:$0xff] }
  0x75   : > { %2683 = vmatpush3.bf16.msra.mxu1 %v2989_v11  ;;  %2638 = vmatprep.subr.bf16.mxu0 %v2990_v12  ;;  %v3011_v5 = vld [vmem:[%s3905_s1 + $0x318] sm:$0xff]   ;;  %v261_v59 = vld [vmem:[%s3265_s24 + $0x1e0] sm:$0xff] }
  0x76   : > { %2684 = vmatprep.subr.bf16.mxu1 %v2992_v14  ;;  %v324_v11 = vld [vmem:[%s3265_s24 + $0x3d8] sm:$0xff]  ;;  %v305_v14 = vld [vmem:[%s3265_s24 + $0x340] sm:$0xff] }
  0x78   : > { %2639 = vmatpush3.bf16.msra.mxu0 %v2991_v13  ;;  %v3013_v13 = vld [vmem:[%s3905_s1 + $0x398] sm:$0xff]  }
  0x79   : > { %2685 = vmatpush3.bf16.msra.mxu1 %v2993_v15  ;;  %2716 = vmatprep.subr.bf16.mxu0 %v2994_v28  ;;  %v321_v15 = vld [vmem:[%s3265_s24 + $0x3c0] sm:$0xff] }
  0x7a   : > { %1665 = vmatmul.mubr.bf16.gmra.mxu0 %v413_v8  ;;  %2762 = vmatprep.subr.bf16.mxu1 %v2996_v30  ;;  %v322_v8 = vld [vmem:[%s3265_s24 + $0x3c8] sm:$0xff]  ;;  %v401_v16 = vpack.c.bf16 %v321_v15, %v305_v14  ;;  %v337_v30 = vld [vmem:[%s3265_s24 + $0x440] sm:$0xff] }
  0x7b   : > { %1737 = vmatmul.mubr.bf16.gmra.mxu1 %v415_v9  ;;  %1776 = vmatprep.mubr.bf16.mxu0 %v354_v19  ;;  %v308_v9 = vld [vmem:[%s3265_s24 + $0x358] sm:$0xff]  ;;  %v402_v10 = vpack.c.bf16 %v322_v8, %v306_v7  ;;  %v403_v19 = vpack.c.bf16 %v323_v18, %v307_v17  ;;  %v293_v7 = vld [vmem:[%s3265_s24 + $0x2e0] sm:$0xff]  ;;  %v279_v8 = vld [vmem:[%s3265_s24 + $0x270] sm:$0xff] }
  0x7c   : > { %1848 = vmatprep.mubr.bf16.mxu1 %v356_v23  ;;  %v404_v12 = vpack.c.bf16 %v324_v11, %v308_v9  ;;  %v3017_v23 = vld [vmem:[%s3905_s1 + $0x390] sm:$0xff]   ;;  %v326_v11 = vld [vmem:[%s3265_s24 + $0x3e8] sm:$0xff]  ;;  %v309_v18 = vld [vmem:[%s3265_s24 + $0x360] sm:$0xff] }
  0x7d   : > { %v295_v9 = vld [vmem:[%s3265_s24 + $0x2f0] sm:$0xff] }
  0x7e   : > { %v391_v15 = vpack.c.bf16 %v295_v9, %v279_v8 }
  0x82   : > { %1777 = vmatmul.mubr.bf16.vlgmr.msra.gmra.mxu0 %v353_v24  ;;  %v3018_v24 = vld [vmem:[%s3905_s1 + $0x348] sm:$0xff]  }
  0x83   : > { %1849 = vmatmul.mubr.bf16.vlgmr.msra.gmra.mxu1 %v355_v27  ;;  %2717 = vmatpush3.bf16.msra.mxu0 %v2995_v29  ;;  %v340_v27 = vld [vmem:[%s3265_s24 + $0x458] sm:$0xff]  ;;  %v3019_v29 = vld [vmem:[%s3905_s1 + $0x308] sm:$0xff]  }
  0x84   : > { %2763 = vmatpush3.bf16.msra.mxu1 %v2997_v31  ;;  %2718 = vmatprep.subr.bf16.mxu0 %v2998_v32  ;;  %v420_v28 = vpack.c.bf16 %v340_v27, %v340_v27  ;;  %v339_v31 = vld [vmem:[%s3265_s24 + $0x450] sm:$0xff]  ;;  %v417_v32 = vpack.c.bf16 %v337_v30, %v337_v30 }
  0x85   : > { %1784 = vmatprep.mubr.bf16.mxu0 %v370_v38  ;;  %1856 = vmatprep.mubr.bf16.mxu1 %v372_v39  ;;  %v3024_v38 = vld [vmem:[%s3905_s1 + $0x3c0] sm:$0xff]  }
  0x86   : > { %2764 = vmatprep.subr.bf16.mxu1 %v3000_v40  ;;  %v3025_v39 = vld [vmem:[%s3905_s1 + $0x380] sm:$0xff]   ;;  %v214_v40 = vld [vmem:[%s3265_s24 + $0x68] sm:$0xff] }
  0x87   : > { %2719 = vmatpush3.bf16.msra.mxu0 %v2999_v33  ;;  %v419_v33 = vpack.c.bf16 %v339_v31, %v339_v31  ;;  %v358_v43 = vpack.c.bf16 %v230_v41, %v214_v40 }
  0x88   : > { %2765 = vmatpush3.bf16.msra.mxu1 %v3001_v47  ;;  %2720 = vmatprep.subr.bf16.mxu0 %v3002_v48 }
  0x89   : > { %2766 = vmatprep.subr.bf16.mxu1 %v3004_v50  ;;  %v231_v50 = vld [vmem:[%s3265_s24 + $0xf0] sm:$0xff] }
  0x8a   : > { %1785 = vmatmul.mubr.bf16.gmra.mxu0 %v369_v44  ;;  %v232_v44 = vld [vmem:[%s3265_s24 + $0xf8] sm:$0xff] }
  0x8b   : > { %1857 = vmatmul.mubr.bf16.gmra.mxu1 %v371_v46  ;;  %2721 = vmatpush3.bf16.msra.mxu0 %v3003_v49  ;;  %v229_v46 = vld [vmem:[%s3265_s24 + $0xe0] sm:$0xff]  ;;  %v360_v47 = vpack.c.bf16 %v232_v44, %v216_v42  ;;  %v215_v49 = vld [vmem:[%s3265_s24 + $0x70] sm:$0xff] }
  0x8c   : > { %2767 = vmatpush3.bf16.msra.mxu1 %v3005_v51  ;;  %1792 = vmatprep.mubr.bf16.mxu0 %v386_v54  ;;  %v357_v48 = vpack.c.bf16 %v229_v46, %v213_v45  ;;  %v246_v51 = vld [vmem:[%s3265_s24 + $0x168] sm:$0xff]  ;;  %v359_v52 = vpack.c.bf16 %v231_v50, %v215_v49  ;;  %v248_v54 = vld [vmem:[%s3265_s24 + $0x178] sm:$0xff] }
  0x8d   : > { %1864 = vmatprep.mubr.bf16.mxu1 %v388_v57  ;;  %2722 = vmatprep.subr.bf16.mxu0 %v3006_v58  ;;  %v374_v56 = vpack.c.bf16 %v262_v53, %v246_v51  ;;  %v376_v57 = vpack.c.bf16 %v264_v55, %v248_v54  ;;  %v245_v58 = vld [vmem:[%s3265_s24 + $0x160] sm:$0xff] }
  0x8e   : > { %2768 = vmatprep.subr.bf16.mxu1 %v3008_v2  ;;  %v373_v2 = vpack.c.bf16 %v261_v59, %v245_v58 }
  0x8f   : > { %2723 = vmatpush3.bf16.msra.mxu0 %v3007_v1  ;;  %v296_v1 = vld [vmem:[%s3265_s24 + $0x2f8] sm:$0xff] }
  0x90   : > { %2769 = vmatpush3.bf16.msra.mxu1 %v3009_v3  ;;  %2724 = vmatprep.subr.bf16.mxu0 %v3010_v4  ;;  %v375_v3 = vpack.c.bf16 %v263_v61, %v247_v60 }
  0x91   : > { %2770 = vmatprep.subr.bf16.mxu1 %v3012_v6  ;;  %v277_v6 = vld [vmem:[%s3265_s24 + $0x260] sm:$0xff] }
  0x92   : > { %1793 = vmatmul.mubr.bf16.gmra.mxu0 %v385_v63  ;;  %v294_v63 = vld [vmem:[%s3265_s24 + $0x2e8] sm:$0xff]  ;;  %v389_v14 = vpack.c.bf16 %v293_v7, %v277_v6 }
  0x93   : > { %1865 = vmatmul.mubr.bf16.gmra.mxu1 %v387_v0  ;;  %2725 = vmatpush3.bf16.msra.mxu0 %v3011_v5  ;;  %v280_v0 = vld [vmem:[%s3265_s24 + $0x278] sm:$0xff]  ;;  %v390_v4 = vpack.c.bf16 %v294_v63, %v278_v62 }
  0x94   : > { %1800 = vmatprep.mubr.bf16.mxu0 %v402_v10  ;;  %1872 = vmatprep.mubr.bf16.mxu1 %v404_v12  ;;  %v392_v5 = vpack.c.bf16 %v296_v1, %v280_v0  ;;  %v310_v10 = vld [vmem:[%s3265_s24 + $0x368] sm:$0xff]  ;;  %v312_v12 = vld [vmem:[%s3265_s24 + $0x378] sm:$0xff] }
  0x95   : > { %2771 = vmatpush3.bf16.msra.mxu1 %v3013_v13  ;;  %2726 = vmatprep.subr.bf16.mxu0 %v3014_v20  ;;  %v328_v13 = vld [vmem:[%s3265_s24 + $0x3f8] sm:$0xff]  ;;  %v311_v20 = vld [vmem:[%s3265_s24 + $0x370] sm:$0xff] }
  0x96   : > { %2772 = vmatprep.subr.bf16.mxu1 %v3016_v22  ;;  %v408_v17 = vpack.c.bf16 %v328_v13, %v312_v12  ;;  %v342_v22 = vld [vmem:[%s3265_s24 + $0x468] sm:$0xff] }
  0x97   : > { %2727 = vmatpush3.bf16.msra.mxu0 %v3015_v21  ;;  %v327_v21 = vld [vmem:[%s3265_s24 + $0x3f0] sm:$0xff] }
  0x98   : > { %2728 = vmatprep.subr.bf16.mxu0 %v3018_v24  ;;  %v407_v25 = vpack.c.bf16 %v327_v21, %v311_v20 }
  0x99   : > { %2773 = vmatpush3.bf16.msra.mxu1 %v3017_v23  ;;  %v344_v23 = vld [vmem:[%s3265_s24 + $0x478] sm:$0xff] }
  0x9a   : > { %1801 = vmatmul.mubr.bf16.gmra.mxu0 %v401_v16  ;;  %2774 = vmatprep.subr.bf16.mxu1 %v3020_v34  ;;  %v406_v16 = vpack.c.bf16 %v326_v11, %v310_v10  ;;  %v424_v27 = vpack.c.bf16 %v344_v23, %v344_v23  ;;  %v3708_v34 = vld [vmem:[%s3906_s2] ss:$0 sm:$0xff] }
  0x9b   : > { %1873 = vmatmul.mubr.bf16.gmra.mxu1 %v403_v19  ;;  %1808 = vmatprep.mubr.bf16.mxu0 %v418_v26  ;;  %v325_v19 = vld [vmem:[%s3265_s24 + $0x3e0] sm:$0xff]  ;;  %v422_v26 = vpack.c.bf16 %v342_v22, %v342_v22 }
  0x9c   : > { %1880 = vmatprep.mubr.bf16.mxu1 %v420_v28  ;;  %2729 = vmatpush3.bf16.msra.mxu0 %v3019_v29  ;;  %v405_v24 = vpack.c.bf16 %v325_v19, %v309_v18  ;;  %v341_v28 = vld [vmem:[%s3265_s24 + $0x460] sm:$0xff]  ;;  %v343_v29 = vld [vmem:[%s3265_s24 + $0x470] sm:$0xff]  ;;  %s175_s24 = sand.u32 1, %s3076_s12  }
  0x9d   : > { %2775 = vmatpush3.bf16.msra.mxu1 %v3021_v35  ;;  %2730 = vmatprep.subr.bf16.mxu0 %v3022_v36  ;;  %v421_v30 = vpack.c.bf16 %v341_v28, %v341_v28  ;;  %v423_v31 = vpack.c.bf16 %v343_v29, %v343_v29  ;;  %s2808_s7 = smul.u32 72, %s175_s24 }
  0x9e   : > { %2776 = vmatprep.subr.bf16.mxu1 %v3024_v38 }
  0x9f   : > { %s3808_s12 = scalar_lea.vmem [#allocation2], %s2808_s7  }
  0xa0   : > { %2731 = vmatpush3.bf16.msra.mxu0 %v3023_v37 }
  0xa1   : > { %2777 = vmatpush3.bf16.msra.mxu1 %v3025_v39 }
  0xa2   : > { %1809 = vmatmul.mubr.bf16.gmra.mxu0 %v417_v32 }
  0xa3   : > { %1881 = vmatmul.mubr.bf16.gmra.mxu1 %v419_v33  ;;  %1920 = vmatprep.mubr.bf16.mxu0 %v358_v43 }
  0xa4   : > { %1992 = vmatprep.mubr.bf16.mxu1 %v360_v47 }
  0xaa   : > { %1921 = vmatmul.mubr.bf16.vlgmr.msra.gmra.mxu0 %v357_v48 }
  0xab   : > { %1993 = vmatmul.mubr.bf16.vlgmr.msra.gmra.mxu1 %v359_v52  ;;  %1928 = vmatprep.mubr.bf16.mxu0 %v374_v56 }
  0xac   : > { %2000 = vmatprep.mubr.bf16.mxu1 %v376_v57 }
  0xb2   : > { %1929 = vmatmul.mubr.bf16.gmra.mxu0 %v373_v2 }
  0xb3   : > { %2001 = vmatmul.mubr.bf16.gmra.mxu1 %v375_v3  ;;  %1936 = vmatprep.mubr.bf16.mxu0 %v390_v4 }
  0xb4   : > { %2008 = vmatprep.mubr.bf16.mxu1 %v392_v5 }
  0xba   : > { %1937 = vmatmul.mubr.bf16.gmra.mxu0 %v389_v14 }
  0xbb   : > { %2009 = vmatmul.mubr.bf16.gmra.mxu1 %v391_v15  ;;  %1944 = vmatprep.mubr.bf16.mxu0 %v406_v16 }
  0xbc   : > { %2016 = vmatprep.mubr.bf16.mxu1 %v408_v17 }
  0xc2   : > { %1945 = vmatmul.mubr.bf16.gmra.mxu0 %v405_v24 }
  0xc3   : > { %2017 = vmatmul.mubr.bf16.gmra.mxu1 %v407_v25  ;;  %1952 = vmatprep.mubr.bf16.mxu0 %v422_v26 }
  0xc4   : > { %2024 = vmatprep.mubr.bf16.mxu1 %v424_v27 }
  0xca   : > { %1953 = vmatmul.mubr.bf16.gmra.mxu0 %v421_v30 }
  0xcb   : > { %2025 = vmatmul.mubr.bf16.gmra.mxu1 %v423_v31 }
  0xf2   : > { %v2456_v32 = vpop.f32.mrf.mxu0 }
  0xf3   : > { %v2502_v33 = vpop.f32.mrf.mxu1 }
  0xf4   : > { %v2457_v35 = vpop.f32.mrf.mxu0 }
  0xf5   : > { %v2458_v36 = vadd.f32 %v2457_v35, %v2456_v32  ;;  %v2503_v37 = vpop.f32.mrf.mxu1 }
  0xf6   : > { %v2504_v38 = vadd.f32 %v2503_v37, %v2502_v33  ;;  %v2459_v39 = vpop.f32.mrf.mxu0 }
  0xf7   : > { %v1491_v40 = vadd.f32 %v2458_v36, %v3708_v34  ;;  %v2505_v41 = vpop.f32.mrf.mxu1 }
  0xf8   : > { %v2460_v42 = vpop.f32.mrf.mxu0 }
  0xf9   : > { %v3711_v43 = vadd.f32 %v2504_v38, %v1491_v40  ;;  %v2461_v44 = vadd.f32 %v2460_v42, %v2459_v39  ;;  %v2506_v45 = vpop.f32.mrf.mxu1 }
  0xfa   : > { %v2507_v46 = vadd.f32 %v2506_v45, %v2505_v41  ;;  %v2462_v48 = vpop.f32.mrf.mxu0 }
  0xfb   : > { %v1494_v47 = vadd.f32 %v2461_v44, %v3708_v34  ;;  %v2508_v50 = vpop.f32.mrf.mxu1 }
  0xfc   : > { %v2463_v51 = vpop.f32.mrf.mxu0 }
  0xfd   : > { %v3714_v49 = vadd.f32 %v2507_v46, %v1494_v47  ;;  %v2464_v52 = vadd.f32 %v2463_v51, %v2462_v48  ;;  %v2509_v53 = vpop.f32.mrf.mxu1 }
  0xfe   : > { %v2510_v54 = vadd.f32 %v2509_v53, %v2508_v50  ;;  %v2465_v55 = vpop.f32.mrf.mxu0 }
  0xff   : > { %v1499_v56 = vadd.f32 %v2464_v52, %v3708_v34  ;;  %v2511_v57 = vpop.f32.mrf.mxu1 }
 0x100   : > { %v2466_v58 = vpop.f32.mrf.mxu0 }
 0x101   : > { %v3717_v59 = vadd.f32 %v2510_v54, %v1499_v56  ;;  %v2467_v60 = vadd.f32 %v2466_v58, %v2465_v55  ;;  %v2512_v61 = vpop.f32.mrf.mxu1 }
 0x102   : > { %v2513_v62 = vadd.f32 %v2512_v61, %v2511_v57  ;;  %v2468_v0 = vpop.f32.mrf.mxu0 }
 0x103   : > { %v1502_v63 = vadd.f32 %v2467_v60, %v3708_v34  ;;  %v2514_v1 = vpop.f32.mrf.mxu1 }
 0x104   : > { %v2469_v3 = vpop.f32.mrf.mxu0 }
 0x105   : > { %v3720_v2 = vadd.f32 %v2513_v62, %v1502_v63  ;;  %v2515_v4 = vpop.f32.mrf.mxu1  ;;  %v2470_v5 = vadd.f32 %v2469_v3, %v2468_v0 }
 0x106   : > { %v2516_v6 = vadd.f32 %v2515_v4, %v2514_v1  ;;  %v2471_v7 = vpop.f32.mrf.mxu0 }
 0x107   : > { %v2517_v8 = vpop.f32.mrf.mxu1  ;;  %v1507_v9 = vadd.f32 %v2470_v5, %v3708_v34 }
 0x108   : > { %v2472_v10 = vpop.f32.mrf.mxu0 }
 0x109   : > { %v2518_v11 = vpop.f32.mrf.mxu1  ;;  %v3723_v12 = vadd.f32 %v2516_v6, %v1507_v9  ;;  %v2473_v13 = vadd.f32 %v2472_v10, %v2471_v7 }
 0x10a   : > { %v2519_v14 = vadd.f32 %v2518_v11, %v2517_v8  ;;  %v2474_v16 = vpop.f32.mrf.mxu0 }
 0x10b   : > { %v1510_v15 = vadd.f32 %v2473_v13, %v3708_v34  ;;  %v2520_v17 = vpop.f32.mrf.mxu1 }
 0x10c   : > { %v2475_v19 = vpop.f32.mrf.mxu0 }
 0x10d   : > { %v3726_v18 = vadd.f32 %v2519_v14, %v1510_v15  ;;  %v2476_v20 = vadd.f32 %v2475_v19, %v2474_v16  ;;  %v2521_v21 = vpop.f32.mrf.mxu1 }
 0x10e   : > { %v2522_v22 = vadd.f32 %v2521_v21, %v2520_v17  ;;  %v2477_v23 = vpop.f32.mrf.mxu0 }
 0x10f   : > { %v1515_v24 = vadd.f32 %v2476_v20, %v3708_v34  ;;  %v2523_v25 = vpop.f32.mrf.mxu1 }
 0x110   : > { %v2478_v26 = vpop.f32.mrf.mxu0 }
 0x111   : > { %v3729_v27 = vadd.f32 %v2522_v22, %v1515_v24  ;;  %v2479_v28 = vadd.f32 %v2478_v26, %v2477_v23  ;;  %v2524_v29 = vpop.f32.mrf.mxu1 }
 0x112   : > { %v2525_v30 = vadd.f32 %v2524_v29, %v2523_v25  ;;  %v2480_v31 = vpop.f32.mrf.mxu0 }
 0x113   : > { %v1518_v32 = vadd.f32 %v2479_v28, %v3708_v34  ;;  %v2526_v33 = vpop.f32.mrf.mxu1 }
 0x114   : > { %v2481_v35 = vpop.f32.mrf.mxu0 }
 0x115   : > { %v3732_v36 = vadd.f32 %v2525_v30, %v1518_v32  ;;  %v2482_v37 = vadd.f32 %v2481_v35, %v2480_v31  ;;  %v2527_v38 = vpop.f32.mrf.mxu1 }
 0x116   : > { %v2528_v39 = vadd.f32 %v2527_v38, %v2526_v33  ;;  %v2483_v40 = vpop.f32.mrf.mxu0 }
 0x117   : > { %v1523_v41 = vadd.f32 %v2482_v37, %v3708_v34  ;;  %v2529_v42 = vpop.f32.mrf.mxu1 }
 0x118   : > { %v2484_v44 = vpop.f32.mrf.mxu0 }
 0x119   : > { %v3735_v45 = vadd.f32 %v2528_v39, %v1523_v41  ;;  %v2530_v46 = vpop.f32.mrf.mxu1 }
 0x11a   : > { %v2548_v47 = vpop.f32.mrf.mxu0 }
 0x11b   : > { %v2594_v48 = vpop.f32.mrf.mxu1 }
 0x11c   : > { %v2549_v50 = vpop.f32.mrf.mxu0 }
 0x11d   : > { %v2550_v51 = vadd.f32 %v2549_v50, %v2548_v47  ;;  %v2595_v52 = vpop.f32.mrf.mxu1 }
 0x11e   : > { %v2596_v53 = vadd.f32 %v2595_v52, %v2594_v48  ;;  %v2551_v54 = vpop.f32.mrf.mxu0 }
 0x11f   : > { %v1635_v55 = vadd.f32 %v2550_v51, %v3711_v43  ;;  %v2597_v56 = vpop.f32.mrf.mxu1 }
 0x120   : > { %v2552_v57 = vpop.f32.mrf.mxu0 }
 0x121   : > { %v3738_v58 = vadd.f32 %v2596_v53, %v1635_v55  ;;  %v2553_v60 = vadd.f32 %v2552_v57, %v2551_v54  ;;  %v2598_v34 = vpop.f32.mrf.mxu1 }
 0x122   : > { %v2599_v61 = vadd.f32 %v2598_v34, %v2597_v56  ;;  %v2554_v63 = vpop.f32.mrf.mxu0 }
 0x123   : > { %v1638_v62 = vadd.f32 %v2553_v60, %v3714_v49  ;;  %v2600_v1 = vpop.f32.mrf.mxu1 }
 0x124   : > { %v2555_v3 = vpop.f32.mrf.mxu0 }
 0x125   : > { %v3741_v0 = vadd.f32 %v2599_v61, %v1638_v62  ;;  %v2556_v4 = vadd.f32 %v2555_v3, %v2554_v63  ;;  %v2601_v5 = vpop.f32.mrf.mxu1 }
 0x126   : > { %v2602_v6 = vadd.f32 %v2601_v5, %v2600_v1  ;;  %v2557_v7 = vpop.f32.mrf.mxu0 }
 0x127   : > { %v1643_v43 = vadd.f32 %v2556_v4, %v3717_v59  ;;  %v2603_v8 = vpop.f32.mrf.mxu1 }
 0x128   : > { %v2558_v9 = vpop.f32.mrf.mxu0 }
 0x129   : > { %v3744_v10 = vadd.f32 %v2602_v6, %v1643_v43  ;;  %v2559_v11 = vadd.f32 %v2558_v9, %v2557_v7  ;;  %v2604_v13 = vpop.f32.mrf.mxu1 }
 0x12a   : > { %v2605_v14 = vadd.f32 %v2604_v13, %v2603_v8  ;;  %v2560_v15 = vpop.f32.mrf.mxu0 }
 0x12b   : > { %v1646_v49 = vadd.f32 %v2559_v11, %v3720_v2  ;;  %v2606_v16 = vpop.f32.mrf.mxu1 }
 0x12c   : > { %v2561_v19 = vpop.f32.mrf.mxu0 }
 0x12d   : > { %v3747_v17 = vadd.f32 %v2605_v14, %v1646_v49  ;;  %v2607_v20 = vpop.f32.mrf.mxu1  ;;  %v2562_v21 = vadd.f32 %v2561_v19, %v2560_v15 }
 0x12e   : > { %v2608_v22 = vadd.f32 %v2607_v20, %v2606_v16  ;;  %v2563_v23 = vpop.f32.mrf.mxu0 }
 0x12f   : > { %v2609_v24 = vpop.f32.mrf.mxu1  ;;  %v1651_v59 = vadd.f32 %v2562_v21, %v3723_v12 }
 0x130   : > { %v2564_v25 = vpop.f32.mrf.mxu0 }
 0x131   : > { %v2610_v26 = vpop.f32.mrf.mxu1  ;;  %v3750_v28 = vadd.f32 %v2608_v22, %v1651_v59  ;;  %v2565_v29 = vadd.f32 %v2564_v25, %v2563_v23 }
 0x132   : > { %v2611_v30 = vadd.f32 %v2610_v26, %v2609_v24  ;;  %v2566_v31 = vpop.f32.mrf.mxu0 }
 0x133   : > { %v1654_v2 = vadd.f32 %v2565_v29, %v3726_v18  ;;  %v2612_v32 = vpop.f32.mrf.mxu1 }
 0x134   : > { %v2567_v35 = vpop.f32.mrf.mxu0 }
 0x135   : > { %v3753_v33 = vadd.f32 %v2611_v30, %v1654_v2  ;;  %v2568_v37 = vadd.f32 %v2567_v35, %v2566_v31  ;;  %v2613_v38 = vpop.f32.mrf.mxu1 }
 0x136   : > { %v2614_v39 = vadd.f32 %v2613_v38, %v2612_v32  ;;  %v2569_v40 = vpop.f32.mrf.mxu0 }
 0x137   : > { %v1659_v41 = vadd.f32 %v2568_v37, %v3729_v27  ;;  %v2615_v12 = vpop.f32.mrf.mxu1 }
 0x138   : > { %v2570_v42 = vpop.f32.mrf.mxu0 }
 0x139   : > { %v3756_v44 = vadd.f32 %v2614_v39, %v1659_v41  ;;  %v2571_v46 = vadd.f32 %v2570_v42, %v2569_v40  ;;  %v2616_v47 = vpop.f32.mrf.mxu1 }
 0x13a   : > { %v2617_v48 = vadd.f32 %v2616_v47, %v2615_v12  ;;  %v2572_v50 = vpop.f32.mrf.mxu0 }
 0x13b   : > { %v1662_v18 = vadd.f32 %v2571_v46, %v3732_v36  ;;  %v2618_v51 = vpop.f32.mrf.mxu1 }
 0x13c   : > { %v2573_v52 = vpop.f32.mrf.mxu0 }
 0x13d   : > { %v3759_v53 = vadd.f32 %v2617_v48, %v1662_v18  ;;  %v2574_v54 = vadd.f32 %v2573_v52, %v2572_v50  ;;  %v2619_v55 = vpop.f32.mrf.mxu1 }
 0x13e   : > { %v2620_v56 = vadd.f32 %v2619_v55, %v2618_v51  ;;  %v2575_v57 = vpop.f32.mrf.mxu0 }
 0x13f   : > { %v1667_v27 = vadd.f32 %v2574_v54, %v3735_v45  ;;  %v2621_v60 = vpop.f32.mrf.mxu1 }
 0x140   : > { %v2576_v34 = vpop.f32.mrf.mxu0 }
 0x141   : > { %v3762_v61 = vadd.f32 %v2620_v56, %v1667_v27  ;;  %v2622_v62 = vpop.f32.mrf.mxu1 }
 0x142   : > { %v2640_v63 = vpop.f32.mrf.mxu0 }
 0x143   : > { %v2686_v1 = vpop.f32.mrf.mxu1 }
 0x144   : > { %v2641_v3 = vpop.f32.mrf.mxu0 }
 0x145   : > { %v2687_v4 = vpop.f32.mrf.mxu1  ;;  %v2642_v39 = vadd.f32 %v2641_v3, %v2640_v63 }
 0x146   : > { %v2643_v36 = vpop.f32.mrf.mxu0  ;;  %v2688_v18 = vadd.f32 %v2687_v4, %v2686_v1 }
 0x147   : > { %v2689_v5 = vpop.f32.mrf.mxu1  ;;  %v1779_v46 = vadd.f32 %v2642_v39, %v3738_v58 }
 0x148   : > { %v2644_v6 = vpop.f32.mrf.mxu0 }
 0x149   : > { %v2690_v7 = vpop.f32.mrf.mxu1  ;;  %v2645_v47 = vadd.f32 %v2644_v6, %v2643_v36  ;;  %v1851_v54 = vadd.f32 %v2688_v18, %v1779_v46 }
 0x14a   : > { %v2646_v43 = vpop.f32.mrf.mxu0  ;;  %v2691_v34 = vadd.f32 %v2690_v7, %v2689_v5 }
 0x14b   : > { %v2692_v8 = vpop.f32.mrf.mxu1  ;;  %v1782_v55 = vadd.f32 %v2645_v47, %v3741_v0 }
 0x14c   : > { %v2647_v9 = vpop.f32.mrf.mxu0 }
 0x14d   : > { %v2693_v11 = vpop.f32.mrf.mxu1  ;;  %v2648_v56 = vadd.f32 %v2647_v9, %v2646_v43  ;;  %v1854_v6 = vadd.f32 %v2691_v34, %v1782_v55 }
 0x14e   : > { %v2649_v13 = vpop.f32.mrf.mxu0 }
 0x14f   : > { %v3764_v14 = vpop.f32.mrf.mxu1  ;;  %v1787_v39 = vadd.f32 %v2648_v56, %v3744_v10 }
 0x150   : > { %v2650_v45 = vpop.f32.mrf.mxu0 }
 0x151   : > { %v3766_v49 = vpop.f32.mrf.mxu1  ;;  %v2651_v58 = vadd.f32 %v2650_v45, %v2649_v13 }
 0x152   : > { %v2652_v15 = vpop.f32.mrf.mxu0 }
 0x153   : > { %v3768_v16 = vpop.f32.mrf.mxu1  ;;  %v1790_v43 = vadd.f32 %v2651_v58, %v3747_v17 }
 0x154   : > { %v2653_v19 = vpop.f32.mrf.mxu0 }
 0x155   : > { %v3770_v20 = vpop.f32.mrf.mxu1  ;;  %v2654_v45 = vadd.f32 %v2653_v19, %v2652_v15 }
 0x156   : > { %v3772_v21 = vpop.f32.mrf.mxu0 }
 0x157   : > { %v3774_v22 = vpop.f32.mrf.mxu1 }
 0x158   : > { %v3776_v23 = vpop.f32.mrf.mxu0 }
 0x159   : > { %v3778_v24 = vpop.f32.mrf.mxu1  ;;  %v2657_v17 = vadd.f32 %v3776_v23, %v3772_v21 }
 0x15a   : > { %v3780_v59 = vpop.f32.mrf.mxu0  ;;  %v2703_v58 = vadd.f32 %v3778_v24, %v3774_v22 }
 0x15b   : > { %v3782_v25 = vpop.f32.mrf.mxu1 }
 0x15c   : > { %v3784_v26 = vpop.f32.mrf.mxu0 }
 0x15d   : > { %v3786_v29 = vpop.f32.mrf.mxu1 }
 0x15e   : > { %v3788_v30 = vpop.f32.mrf.mxu0 }
 0x15f   : > { %v3790_v2 = vpop.f32.mrf.mxu1 }
 0x160   : > { %v3792_v31 = vpop.f32.mrf.mxu0 }
 0x161   : > { %v3794_v32 = vpop.f32.mrf.mxu1 }
 0x162   : > { %v3796_v35 = vpop.f32.mrf.mxu0 }
 0x163   : > { %v3798_v37 = vpop.f32.mrf.mxu1 }
 0x164   : > { %v3800_v38 = vpop.f32.mrf.mxu0 }
 0x165   : > { %v3802_v40 = vpop.f32.mrf.mxu1 }
 0x166   : > { %v2667_v41 = vpop.f32.mrf.mxu0 }
 0x167   : > { %v2713_v12 = vpop.f32.mrf.mxu1 }
 0x168   : > { %v2668_v42 = vpop.f32.mrf.mxu0 }
 0x169   : > { %v2714_v48 = vpop.f32.mrf.mxu1  ;;  %v2694_v42 = vadd.f32 %v2693_v11, %v2692_v8  ;;  %v2697_v8 = vadd.f32 %v3766_v49, %v3764_v14  ;;  %v2700_v14 = vadd.f32 %v3770_v20, %v3768_v16 }
 0x16a   : > { %v2732_v50 = vpop.f32.mrf.mxu0 }
 0x16b   : > { %v2778_v51 = vpop.f32.mrf.mxu1  ;;  %v1859_v13 = vadd.f32 %v2694_v42, %v1787_v39 }
 0x16c   : > { %v2733_v52 = vpop.f32.mrf.mxu0 }
 0x16d   : > { %v2734_v57 = vadd.f32 %v2733_v52, %v2732_v50  ;;  %v2779_v27 = vpop.f32.mrf.mxu1 }
 0x16e   : > { %v2735_v60 = vpop.f32.mrf.mxu0  ;;  %v2780_v63 = vadd.f32 %v2779_v27, %v2778_v51  ;;  %v1862_v51 = vadd.f32 %v2697_v8, %v1790_v43 }
 0x16f   : > { %v1923_v62 = vadd.f32 %v2734_v57, %v1851_v54  ;;  %v2781_v3 = vpop.f32.mrf.mxu1  ;;  %v1795_v54 = vadd.f32 %v2654_v45, %v3750_v28 }
 0x170   : > { %v2736_v36 = vpop.f32.mrf.mxu0 }
 0x171   : > { %v1995_v1 = vadd.f32 %v2780_v63, %v1923_v62  ;;  %v2737_v4 = vadd.f32 %v2736_v36, %v2735_v60  ;;  %v2782_v41 = vpop.f32.mrf.mxu1  ;;  %v2660_v60 = vadd.f32 %v3784_v26, %v3780_v59  ;;  %v1867_v28 = vadd.f32 %v2700_v14, %v1795_v54 }
 0x172   : > { %v2738_v12 = vpop.f32.mrf.mxu0  ;;  %v2783_v5 = vadd.f32 %v2782_v41, %v2781_v3  ;;  %v1798_v62 = vadd.f32 %v2657_v17, %v3753_v33  ;;  %v2663_v26 = vadd.f32 %v3792_v31, %v3788_v30  ;;  %v2706_v41 = vadd.f32 %v3786_v29, %v3782_v25 }
 0x173   : > { %2032 = vst [vmem:[%s3808_s12] sm:$0xff] %v1995_v1  ;;  %v1926_v0 = vadd.f32 %v2737_v4, %v1854_v6  ;;  %v2784_v7 = vpop.f32.mrf.mxu1  ;;  %v1803_v6 = vadd.f32 %v2660_v60, %v3756_v44  ;;  %v2709_v25 = vadd.f32 %v3794_v32, %v3790_v2 }
 0x174   : > { %v2739_v9 = vpop.f32.mrf.mxu0  ;;  %v1870_v59 = vadd.f32 %v2703_v58, %v1798_v62  ;;  %v1806_v44 = vadd.f32 %v2663_v26, %v3759_v53 }
 0x175   : > { %v1998_v46 = vadd.f32 %v2783_v5, %v1926_v0  ;;  %v2740_v10 = vadd.f32 %v2739_v9, %v2738_v12  ;;  %v2785_v47 = vpop.f32.mrf.mxu1  ;;  %v1875_v0 = vadd.f32 %v2706_v41, %v1803_v6 }
 0x176   : > { %v2741_v11 = vpop.f32.mrf.mxu0  ;;  %v2786_v50 = vadd.f32 %v2785_v47, %v2784_v7  ;;  %v2666_v7 = vadd.f32 %v3800_v38, %v3796_v35 }
 0x177   : > { %2033 = vst [vmem:[%s3808_s12 + $0x8] sm:$0xff] %v1998_v46  ;;  %v1931_v48 = vadd.f32 %v2740_v10, %v1859_v13  ;;  %v2787_v18 = vpop.f32.mrf.mxu1  ;;  %v1878_v10 = vadd.f32 %v2709_v25, %v1806_v44 }
 0x178   : > { %v2742_v52 = vpop.f32.mrf.mxu0  ;;  %v1811_v47 = vadd.f32 %v2666_v7, %v3762_v61 }
 0x179   : > { %v2003_v15 = vadd.f32 %v2786_v50, %v1931_v48  ;;  %v2743_v19 = vadd.f32 %v2742_v52, %v2741_v11  ;;  %v2788_v55 = vpop.f32.mrf.mxu1  ;;  %v2712_v11 = vadd.f32 %v3802_v40, %v3798_v37 }
 0x17a   : > { %v2744_v56 = vpop.f32.mrf.mxu0  ;;  %v2789_v57 = vadd.f32 %v2788_v55, %v2787_v18 }
 0x17b   : > { %2034 = vst [vmem:[%s3808_s12 + $0x10] sm:$0xff] %v2003_v15  ;;  %v1934_v49 = vadd.f32 %v2743_v19, %v1862_v51  ;;  %v2790_v27 = vpop.f32.mrf.mxu1  ;;  %v1883_v18 = vadd.f32 %v2712_v11, %v1811_v47 }
 0x17c   : > { %v2745_v34 = vpop.f32.mrf.mxu0 }
 0x17d   : > { %v2006_v21 = vadd.f32 %v2789_v57, %v1934_v49  ;;  %v2746_v23 = vadd.f32 %v2745_v34, %v2744_v56  ;;  %v2791_v63 = vpop.f32.mrf.mxu1 }
 0x17e   : > { %v2747_v3 = vpop.f32.mrf.mxu0  ;;  %v2792_v20 = vadd.f32 %v2791_v63, %v2790_v27 }
 0x17f   : > { %2035 = vst [vmem:[%s3808_s12 + $0x18] sm:$0xff] %v2006_v21  ;;  %v1939_v16 = vadd.f32 %v2746_v23, %v1867_v28  ;;  %v2793_v36 = vpop.f32.mrf.mxu1 }
 0x180   : > { %v2748_v39 = vpop.f32.mrf.mxu0 }
 0x181   : > { %v2011_v33 = vadd.f32 %v2792_v20, %v1939_v16  ;;  %v2749_v1 = vadd.f32 %v2748_v39, %v2747_v3  ;;  %v2794_v4 = vpop.f32.mrf.mxu1 }
 0x182   : > { %v2750_v12 = vpop.f32.mrf.mxu0  ;;  %v2795_v24 = vadd.f32 %v2794_v4, %v2793_v36 }
 0x183   : > { %2036 = vst [vmem:[%s3808_s12 + $0x20] sm:$0xff] %v2011_v33  ;;  %v1942_v22 = vadd.f32 %v2749_v1, %v1870_v59  ;;  %v2796_v42 = vpop.f32.mrf.mxu1 }
 0x184   : > { %v2751_v5 = vpop.f32.mrf.mxu0 }
 0x185   : > { %v2014_v30 = vadd.f32 %v2795_v24, %v1942_v22  ;;  %v2752_v31 = vadd.f32 %v2751_v5, %v2750_v12  ;;  %v2797_v43 = vpop.f32.mrf.mxu1 }
 0x186   : > { %v2753_v9 = vpop.f32.mrf.mxu0  ;;  %v2798_v13 = vadd.f32 %v2797_v43, %v2796_v42 }
 0x187   : > { %2037 = vst [vmem:[%s3808_s12 + $0x28] sm:$0xff] %v2014_v30  ;;  %v1947_v29 = vadd.f32 %v2752_v31, %v1875_v0  ;;  %v2799_v45 = vpop.f32.mrf.mxu1 }
 0x188   : > { %v2754_v46 = vpop.f32.mrf.mxu0 }
 0x189   : > { %v2019_v53 = vadd.f32 %v2798_v13, %v1947_v29  ;;  %v2755_v8 = vadd.f32 %v2754_v46, %v2753_v9  ;;  %v2800_v35 = vpop.f32.mrf.mxu1 }
 0x18a   : > { %v2756_v38 = vpop.f32.mrf.mxu0  ;;  %v2801_v2 = vadd.f32 %v2800_v35, %v2799_v45 }
 0x18b   : > { %2038 = vst [vmem:[%s3808_s12 + $0x30] sm:$0xff] %v2019_v53  ;;  %v1950_v48 = vadd.f32 %v2755_v8, %v1878_v10  ;;  %v2802_v32 = vpop.f32.mrf.mxu1 }
 0x18c   : > { %v2757_v50 = vpop.f32.mrf.mxu0 }
 0x18d   : > { %v2022_v51 = vadd.f32 %v2801_v2, %v1950_v48  ;;  %v2758_v52 = vadd.f32 %v2757_v50, %v2756_v38  ;;  %v2803_v54 = vpop.f32.mrf.mxu1 }
 0x18e   : > { %v2759_v17 = vpop.f32.mrf.mxu0  ;;  %v2804_v15 = vadd.f32 %v2803_v54, %v2802_v32 }
 0x18f   : > { %2039 = vst [vmem:[%s3808_s12 + $0x38] sm:$0xff] %v2022_v51  ;;  %v1955_v61 = vadd.f32 %v2758_v52, %v1883_v18  ;;  %v2805_v19 = vpop.f32.mrf.mxu1  ;;  %2047 = sbr.rel (!%p3163_p4) target bundleno = 457 (0x1c9), region = 36 }
 0x190   : > { %v2760_v55 = vpop.f32.mrf.mxu0 }
 0x191   : > { %v2027_v56 = vadd.f32 %v2804_v15, %v1955_v61  ;;  %v2806_v14 = vpop.f32.mrf.mxu1 }
 0x193   : > { %2040 = vst [vmem:[%s3808_s12 + $0x40] sm:$0xff] %v2027_v56 }
 0x194   : > { %s3916_s8 = smov (!%p2050_p8, %s2049_s8), 9 }
 0x195   : > { %s2426_s17 = sshll.u32 %s3916_s8, 7 }
 0x196   : > { %p2429_p9 = scmp.eq.s32.totalorder %s2426_s17, 0 }
 0x197   : > { %3026 = sdivrem.u32 (!%p2429_p9), %s3916_s8, 9 }
 0x198   : > { %2058 = sbr.rel (%p2429_p9) target bundleno = 457 (0x1c9), region = 40 }
 0x1a0   : > { %s3858_s20 = spop.drf %3026 }
 0x1a1   : > { %p2430_p10 = scmp.le.s32.totalorder %s3858_s20, 0 }
 0x1a2   : > { %s3909_s15 = smov (!%p2430_p10), %s3852_s14  ;;  %s3910_s30 = smov (!%p2430_p10), %s3808_s12 }
 0x1a3   : > { %2247 = sbr.rel (%p2430_p10) target bundleno = 432 (0x1b0), region = 116  ;;  %s3867_s18 = smov (!%p2430_p10), 0  }
 0x1a4   : > { %s3869_s21 = smov (!%p2430_p10), 0  }
 0x1a8 LB: >> { %v2139_v37 = vld [vmem:[%s3092_s30] sm:$0xff]  ;;  %v2141_v40 = vld [vmem:[%s3092_s30 + $0x8] sm:$0xff]  ;;  %v2143_v49 = vld [vmem:[%s3092_s30 + $0x10] sm:$0xff]  ;;  %s2157_s22 = sadd.s32 1, %s3096_s18  ;;  %s2133_s21 = sadd.s32 1, %s3100_s21   ;;  %s3100_s21 = sphi %s3869_s21, %s2133_s21   ;;  %s3096_s18 = sphi %s3867_s18, %s3911_s18   ;;  %s3092_s30 = sphi %s3910_s30, %s2162_s30   ;;  %s3088_s15 = sphi %s3909_s15, %s2163_s15  }
 0x1a9   : >> { %2140 = vst [vmem:[%s3088_s15] sm:$0xff] %v2139_v37  ;;  %2142 = vst [vmem:[%s3088_s15 + $0x8] sm:$0xff] %v2141_v40  ;;  %v2145_v57 = vld [vmem:[%s3092_s30 + $0x18] sm:$0xff]  ;;  %v2147_v27 = vld [vmem:[%s3092_s30 + $0x20] sm:$0xff]  ;;  %p2158_p11 = scmp.ge.s32.totalorder %s2157_s22, %s3858_s20  ;;  %p2132_p12 = scmp.ge.s32.totalorder %s2133_s21, %s3858_s20 }
 0x1aa   : >> { %2144 = vst [vmem:[%s3088_s15 + $0x10] sm:$0xff] %v2143_v49  ;;  %v2149_v60 = vld [vmem:[%s3092_s30 + $0x28] sm:$0xff]  ;;  %2146 = vst [vmem:[%s3088_s15 + $0x18] sm:$0xff] %v2145_v57  ;;  %v2151_v34 = vld [vmem:[%s3092_s30 + $0x30] sm:$0xff] }
 0x1ab   : >> { %2148 = vst [vmem:[%s3088_s15 + $0x20] sm:$0xff] %v2147_v27  ;;  %2150 = vst [vmem:[%s3088_s15 + $0x28] sm:$0xff] %v2149_v60  ;;  %v2153_v28 = vld [vmem:[%s3092_s30 + $0x38] sm:$0xff]  ;;  %v2155_v62 = vld [vmem:[%s3092_s30 + $0x40] sm:$0xff]  ;;  %s3918_s22 = smov (%p2158_p11, %s2157_s22), 0  ;;  %2135 = sbr.rel (!%p2132_p12) target bundleno = 424 (0x1a8), region = 122 }
 0x1ac   : >> { %2152 = vst [vmem:[%s3088_s15 + $0x30] sm:$0xff] %v2151_v34  ;;  %2154 = vst [vmem:[%s3088_s15 + $0x38] sm:$0xff] %v2153_v28  ;;  %s2160_s23 = smul.u32 72, %s3918_s22  ;;  %s3911_s18 = smov %s3918_s22 }
 0x1ad   : >> { %2156 = vst [vmem:[%s3088_s15 + $0x40] sm:$0xff] %v2155_v62 }
 0x1ae   : >> { %s2162_s30 = scalar_lea.vmem %s3808_s12, %s2160_s23 [#allocation2]   ;;  %s2163_s15 = scalar_lea.vmem %s3852_s14, %s2160_s23  }
 0x1b0 PF: > { %3028 = sdivrem.u32 %s3916_s8, 9 }
 0x1b1   : > { %s2431_s25 = smul.u32 72, %s3858_s20 }
 0x1b3   : > { %s2168_s26 = scalar_lea.vmem %s3808_s12, %s2431_s25 [#allocation2]   ;;  %s2170_s27 = scalar_lea.vmem %s3852_s14, %s2431_s25  }
 0x1b9   : > { %s3029_s28 = spop.drf %3028 }
 0x1ba   : > { %p2433_p13 = scmp.le.s32.totalorder %s3029_s28, 0 }
 0x1bb   : > { %s3102_s29 = smov (!%p2433_p13), %s2170_s27   ;;  %s3106_s4 = smov (!%p2433_p13), %s2168_s26  }
 0x1bc   : > { %2261 = sbr.rel (%p2433_p13) target bundleno = 457 (0x1c9), region = 127  ;;  %s3110_s5 = smov (!%p2433_p13), 0  }
 0x1bd   : > { %s3114_s6 = smov (!%p2433_p13), 0  }
 0x1c1 LB: >> { %v2180_v21 = vld [vmem:[%s3108_s4] sm:$0xff]  ;;  %s2182_s24 = sadd.s32 1, %s3112_s5  ;;  %s2174_s6 = sadd.s32 1, %s3116_s6   ;;  %s3116_s6 = sphi %s3114_s6, %s2174_s6   ;;  %s3112_s5 = sphi %s3110_s5, %s3111_s5   ;;  %s3108_s4 = sphi %s3106_s4, %s2187_s4   ;;  %s3104_s29 = sphi %s3102_s29, %s2188_s29  }
 0x1c2   : >> { %2181 = vst [vmem:[%s3104_s29] sm:$0xff] %v2180_v21  ;;  %p2183_p0 = scmp.ge.s32.totalorder %s2182_s24, %s3029_s28  ;;  %p2173_p1 = scmp.ge.s32.totalorder %s2174_s6, %s3029_s28 }
 0x1c4   : >> { %s3920_s24 = smov (%p2183_p0, %s2182_s24), 0  ;;  %2176 = sbr.rel (!%p2173_p1) target bundleno = 449 (0x1c1), region = 133 }
 0x1c5   : >> { %s2434_s7 = sshll.u32 %s3920_s24, 3  ;;  %s3111_s5 = smov %s3920_s24  }
 0x1c6   : >> { %s2187_s4 = scalar_lea.vmem %s2168_s26, %s2434_s7 [#allocation2]   ;;  %s2188_s29 = scalar_lea.vmem %s2170_s27, %s2434_s7  }
 0x1c9 PF: > { %p10_p2 = scmp.ge.s32.totalorder %s3153_s16, 4   ;;  %s3912_s12 = smov %s3080_s13 }
 0x1ca   : > { %s3913_s13 = smov %s3161_s19  ;;  %s3914_s14 = smov %s3153_s16 }
 0x1cb   :  { %12 = sbr.rel (!%p10_p2) target bundleno = 2 (0x2), region = 144 }

</bundles_post_ra>
